<compile_context>
chip_gen: v6e
topology: v6e:2x2x1
jax: 0.10.0
libtpu: 0.0.40
codegen_flags: <defaults>
</compile_context>

<pallas_src>
import functools
import math

import jax
import jax.numpy as jnp
from jax import lax
from jax.experimental import pallas as pl
from jax.experimental.pallas import tpu as pltpu


def _flash_mha_kernel(x_ref, k_ref, v_ref, wq_ref, wo_ref, bo_ref,
                      o_ref, q_scr, acc_scr, m_scr, l_scr,
                      *, num_heads, head_dim):
    """grid = (batch, q_blocks, kv_blocks); kv is the innermost reduction axis.

    x_ref  : (1, TQ, C)  query-side activations for this (b, qi) block
    k_ref  : (1, TK, C)  pre-projected keys   (K = ctx @ Wk, computed outside)
    v_ref  : (1, TK, C)  pre-projected values (V = ctx @ Wv, computed outside)
    wq_ref : (C, C)      q projection, d**-0.5 score scale pre-folded in
    wo_ref : (C, C)      output projection
    bo_ref : (1, C)      output bias
    o_ref  : (1, TQ, C)  output block (written on the last kv step)

    scratch (persists across the kv axis for a given (b, qi)):
    q_scr   : (TQ, C)  Q in the activation dtype
    acc_scr : (TQ, C)  f32 un-normalized attention output
    m_scr   : (TQ, H)  f32 running max, one column per head
    l_scr   : (TQ, H)  f32 running sum, one column per head
    """
    ki = pl.program_id(2)
    n_kv = pl.num_programs(2)
    block_q = q_scr.shape[0]

    @pl.when(ki == 0)
    def _init():
        # Full-width Q projection once per (b, qi); scale already in wq.
        q = jnp.dot(x_ref[0], wq_ref[...], preferred_element_type=jnp.float32)
        q_scr[...] = q.astype(q_scr.dtype)
        acc_scr[...] = jnp.zeros_like(acc_scr)
        m_scr[...] = jnp.full_like(m_scr, -jnp.inf)
        l_scr[...] = jnp.zeros_like(l_scr)

    k = k_ref[0]                                       # (TK, C)
    v = v_ref[0]                                       # (TK, C)

    # Online softmax per head; accumulator update deferred to ONE full-width
    # (lane-dense) store below.
    alpha_cols, pv_cols, m_cols, l_cols = [], [], [], []
    for h in range(num_heads):
        lo = h * head_dim
        hi = lo + head_dim
        qh = q_scr[:, lo:hi]                           # (TQ, d)
        kh = k[:, lo:hi]                               # (TK, d)
        vh = v[:, lo:hi]                               # (TK, d)

        # Scores: contract the last dims (no explicit transpose of K).
        s = lax.dot_general(qh, kh, (((1,), (1,)), ((), ())),
                            preferred_element_type=jnp.float32)  # (TQ, TK)

        m_prev = m_scr[:, h:h + 1]                     # (TQ, 1)
        m_new = jnp.maximum(m_prev, jnp.max(s, axis=-1, keepdims=True))
        alpha = jnp.exp(m_prev - m_new)                # (TQ, 1) f32
        p = jnp.exp(s - m_new)                         # (TQ, TK) f32
        l_new = alpha * l_scr[:, h:h + 1] + jnp.sum(p, axis=-1, keepdims=True)
        pv = jnp.dot(p.astype(vh.dtype), vh,
                     preferred_element_type=jnp.float32)  # (TQ, d) f32

        alpha_cols.append(jnp.broadcast_to(alpha, (block_q, head_dim)))
        pv_cols.append(pv)
        m_cols.append(m_new)
        l_cols.append(l_new)

    alpha_slab = jnp.concatenate(alpha_cols, axis=-1)   # (TQ, C) f32
    pv_slab = jnp.concatenate(pv_cols, axis=-1)         # (TQ, C) f32
    acc_scr[...] = alpha_slab * acc_scr[...] + pv_slab  # one lane-dense store
    m_scr[...] = jnp.concatenate(m_cols, axis=-1)       # (TQ, H), one store
    l_scr[...] = jnp.concatenate(l_cols, axis=-1)       # (TQ, H), one store

    @pl.when(ki == n_kv - 1)
    def _finalize():
        inv_l = pl.reciprocal(l_scr[...], approx=True)  # (TQ, H), EUP slot
        inv_slab = jnp.concatenate(
            [jnp.broadcast_to(inv_l[:, h:h + 1], (block_q, head_dim))
             for h in range(num_heads)], axis=-1)       # (TQ, C)
        attn = (acc_scr[...] * inv_slab).astype(q_scr.dtype)
        y = jnp.dot(attn, wo_ref[...], preferred_element_type=jnp.float32)
        o_ref[0] = (y + bo_ref[0].astype(jnp.float32)).astype(o_ref.dtype)


def prepare_params(params, *, head_dim, compute_dtype=None):
    """One-time (host-side) parameter prep: fold the d**-0.5 score scale into
    wq and optionally cast everything to the MXU compute dtype (e.g. bf16)."""
    scale = float(head_dim) ** -0.5
    if compute_dtype is None:
        cast = lambda a: a
    else:
        cast = lambda a: a.astype(compute_dtype)
    return {"wq": cast(params["wq"] * scale),
            "wk": cast(params["wk"]),
            "wv": cast(params["wv"]),
            "wo": cast(params["wo"]),
            "bo": cast(params["bo"])}


def _default_vmem_limit_bytes():
    # Generation-aware: ~85% of physical VMEM (v7x only has 64 MiB; v5e/v6e
    # have 128 MiB).  Fall back to a conservative 64 MiB if unavailable.
    try:
        cap = pltpu.get_tpu_info().vmem_capacity_bytes
        return int(cap * 0.85)
    except Exception:
        return 64 * 1024 * 1024


def _const_block_spec(shape, single_buffer):
    """Grid-invariant (weight/bias) BlockSpec; single-buffered when supported."""
    index_map = lambda b, qi, ki: (0,) * len(shape)
    if single_buffer:
        try:
            return pl.BlockSpec(shape, index_map, pipeline_mode=pl.Buffered(1))
        except Exception:  # jax without pipeline_mode / Buffered(1) support
            pass
    return pl.BlockSpec(shape, index_map)


def xformer_mha_forward(x, context, params, *, num_heads, head_dim,
                        block_q=None, block_kv=None, vmem_limit_bytes=None,
                        single_buffer_weights=True):
    """Pallas flash-MHA forward (x_ori math of XFormerMultiHeadAttention).

    x:       [B, L, C]
    context: [B, Lc, Cc] or None (self-attention)
    params:  output of prepare_params (wq pre-scaled; all stored [in, out]).
    """
    if context is None:
        context = x

    B, L, C = x.shape
    Bc, Lc, _ = context.shape
    assert Bc == B, "batch mismatch between x and context"
    assert C == num_heads * head_dim, "C must equal num_heads * head_dim"

    wq, wo = params["wq"], params["wo"]
    bo = params["bo"].reshape(1, C)

    # Hoist the K/V projections out of the flash loop: computed once per call
    # (plain XLA matmuls), not once per (q block, kv block) grid step.
    k = jnp.einsum("blc,cd->bld", context, params["wk"]).astype(x.dtype)
    v = jnp.einsum("blc,cd->bld", context, params["wv"]).astype(x.dtype)

    # bf16 activations need sublane multiples of 16; f32 needs 8.
    min_tile = 16 if jnp.dtype(x.dtype).itemsize < 4 else 8
    if block_q is None:
        block_q = min(L, 256)
    if block_kv is None:
        block_kv = min(Lc, 512)
    # v7x megacore: make sure the parallel (batch x q-block) axes carry >= 2
    # work items so both TensorCores get work.
    if B * (L // block_q) < 2:
        for cand in (block_q // 2, block_q // 4):
            if cand >= min_tile and cand % min_tile == 0 and L % cand == 0:
                block_q = cand
                break
    assert L % block_q == 0 and (block_q % min_tile == 0 or block_q == L)
    assert Lc % block_kv == 0 and (block_kv % min_tile == 0 or block_kv == Lc)
    n_q, n_kv = L // block_q, Lc // block_kv

    if vmem_limit_bytes is None:
        vmem_limit_bytes = _default_vmem_limit_bytes()

    kernel = functools.partial(_flash_mha_kernel, num_heads=num_heads,
                               head_dim=head_dim)

    return pl.pallas_call(
        kernel,
        out_shape=jax.ShapeDtypeStruct((B, L, C), x.dtype),
        grid=(B, n_q, n_kv),
        in_specs=[
            pl.BlockSpec((1, block_q, C), lambda b, qi, ki: (b, qi, 0)),    # x
            pl.BlockSpec((1, block_kv, C), lambda b, qi, ki: (b, ki, 0)),   # K
            pl.BlockSpec((1, block_kv, C), lambda b, qi, ki: (b, ki, 0)),   # V
            _const_block_spec((C, C), single_buffer_weights),               # wq
            _const_block_spec((C, C), single_buffer_weights),               # wo
            _const_block_spec((1, C), single_buffer_weights),               # bo
        ],
        out_specs=pl.BlockSpec((1, block_q, C), lambda b, qi, ki: (b, qi, 0)),
        scratch_shapes=[
            pltpu.VMEM((block_q, C), x.dtype),               # q_scr
            pltpu.VMEM((block_q, C), jnp.float32),           # acc_scr
            pltpu.VMEM((block_q, num_heads), jnp.float32),   # m_scr
            pltpu.VMEM((block_q, num_heads), jnp.float32),   # l_scr
        ],
        compiler_params=pltpu.CompilerParams(
            dimension_semantics=("parallel", "parallel", "arbitrary"),
            vmem_limit_bytes=vmem_limit_bytes),
    )(x, k, v, wq, wo, bo)


def xformer_mha_reference(x, context, params, *, num_heads, head_dim):
    """Pure-JAX port of the PyTorch x_ori path (raw, unscaled params)."""
    if context is None:
        context = x
    b = x.shape[0]
    n, d = num_heads, head_dim
    scale = float(head_dim) ** -0.25

    q = (x @ params["wq"]).reshape(b, -1, n, d)
    k = (context @ params["wk"]).reshape(b, -1, n, d)
    v = (context @ params["wv"]).reshape(b, -1, n, d)

    attn = jnp.einsum("binc,bjnc->bnij", q * scale, k * scale)
    attn = jax.nn.softmax(attn.astype(jnp.float32), axis=-1).astype(x.dtype)
    out = jnp.einsum("bnij,bjnc->binc", attn, v)
    out = out.reshape(b, -1, n * d)
    return out @ params["wo"] + params["bo"]


if __name__ == "__main__":
    # Module config: inner_dim=128 (n_heads=4, d_head=32), context_dim=64.
    # Tokens L = H*W = 8*8 = 64 (image-like), context length Lc = 32.
    B, L, Lc = 2, 64, 32
    DIM, CTX_DIM = 128, 64
    NUM_HEADS = 4
    HEAD_DIM = DIM // NUM_HEADS

    key = jax.random.PRNGKey(0)
    kx, kc, kq, kk, kv, ko, kb, kk2, kv2 = jax.random.split(key, 9)

    x = jax.random.normal(kx, (B, L, DIM), dtype=jnp.float32)
    context = jax.random.normal(kc, (B, Lc, CTX_DIM), dtype=jnp.float32)

    def init_w(k, fan_in, fan_out):
        bound = 1.0 / math.sqrt(fan_in)
        return jax.random.uniform(k, (fan_in, fan_out), jnp.float32,
                                  minval=-bound, maxval=bound)

    bo = jax.random.uniform(kb, (DIM,), jnp.float32,
                            minval=-1.0 / math.sqrt(DIM),
                            maxval=1.0 / math.sqrt(DIM))

    # Cross-attention (context_dim=64) and self-attention raw parameters.
    raw_x = {"wq": init_w(kq, DIM, DIM), "wk": init_w(kk, CTX_DIM, DIM),
             "wv": init_w(kv, CTX_DIM, DIM), "wo": init_w(ko, DIM, DIM),
             "bo": bo}
    raw_s = {"wq": init_w(kq, DIM, DIM), "wk": init_w(kk2, DIM, DIM),
             "wv": init_w(kv2, DIM, DIM), "wo": init_w(ko, DIM, DIM),
             "bo": bo}

    # One-time parameter prep (d**-0.5 folded into wq).
    prep_x = prepare_params(raw_x, head_dim=HEAD_DIM)
    prep_s = prepare_params(raw_s, head_dim=HEAD_DIM)

    ATOL = RTOL = 2e-3  # approx-reciprocal softmax normalization

    # 1) Cross-attention, f32, multi-block grid (B=2, n_q=2, n_kv=2).
    out = xformer_mha_forward(x, context, prep_x, num_heads=NUM_HEADS,
                              head_dim=HEAD_DIM, block_q=32, block_kv=16)
    out = jax.block_until_ready(out)
    ref = xformer_mha_reference(x, context, raw_x,
                                num_heads=NUM_HEADS, head_dim=HEAD_DIM)
    assert out.shape == (B, L, DIM) and out.dtype == x.dtype
    assert jnp.allclose(out, ref, atol=ATOL, rtol=RTOL), "cross-attn mismatch"

    # 2) Self-attention (context=None), multi-block grid as well.
    out_s = xformer_mha_forward(x, None, prep_s, num_heads=NUM_HEADS,
                                head_dim=HEAD_DIM, block_q=32, block_kv=32)
    out_s = jax.block_until_ready(out_s)
    ref_s = xformer_mha_reference(x, None, raw_s,
                                  num_heads=NUM_HEADS, head_dim=HEAD_DIM)
    assert jnp.allclose(out_s, ref_s, atol=ATOL, rtol=RTOL), "self-attn mismatch"

    # 3) bf16 MXU path (weights + activations bf16; softmax stats stay f32).
    x_bf = x.astype(jnp.bfloat16)
    ctx_bf = context.astype(jnp.bfloat16)
    prep_x_bf = prepare_params(raw_x, head_dim=HEAD_DIM,
                               compute_dtype=jnp.bfloat16)
    raw_x_bf = {n: a.astype(jnp.bfloat16) for n, a in raw_x.items()}
    out_bf = xformer_mha_forward(x_bf, ctx_bf, prep_x_bf, num_heads=NUM_HEADS,
                                 head_dim=HEAD_DIM, block_q=32, block_kv=16)
    out_bf = jax.block_until_ready(out_bf)
    ref_bf = xformer_mha_reference(x_bf, ctx_bf, raw_x_bf,
                                   num_heads=NUM_HEADS, head_dim=HEAD_DIM)
    assert out_bf.dtype == jnp.bfloat16
    assert jnp.allclose(out_bf.astype(jnp.float32), ref_bf.astype(jnp.float32),
                        atol=5e-2, rtol=5e-2), "bf16 cross-attn mismatch"

    print("KERNEL_OK")
</pallas_src>

<mosaic_0001>
module attributes {stable_mosaic.version = 11 : i64} {
  func.func @_flash_mha_kernel(%arg0: i32, %arg1: i32, %arg2: i32, %arg3: memref<1x32x128xf32, #tpu.memory_space<vmem>>, %arg4: memref<1x16x128xf32, #tpu.memory_space<vmem>>, %arg5: memref<1x16x128xf32, #tpu.memory_space<vmem>>, %arg6: memref<128x128xf32, #tpu.memory_space<vmem>>, %arg7: memref<128x128xf32, #tpu.memory_space<vmem>>, %arg8: memref<1x128xf32, #tpu.memory_space<vmem>>, %arg9: memref<1x32x128xf32, #tpu.memory_space<vmem>>, %arg10: memref<32x128xf32, #tpu.memory_space<vmem>>, %arg11: memref<32x128xf32, #tpu.memory_space<vmem>>, %arg12: memref<32x4xf32, #tpu.memory_space<vmem>>, %arg13: memref<32x4xf32, #tpu.memory_space<vmem>>) attributes {dimension_semantics = [#tpu.dimension_semantics<parallel>, #tpu.dimension_semantics<parallel>, #tpu.dimension_semantics<arbitrary>], iteration_bounds = array<i64: 2, 2, 2>, scalar_prefetch = 0 : i64, scratch_operands = 4 : i64, tpu.core_type = #tpu.core_type<tc>, window_params = [{transform_indices = @transform_0, window_bounds = array<i64: 1, 32, 128>}, {transform_indices = @transform_1, window_bounds = array<i64: 1, 16, 128>}, {transform_indices = @transform_2, window_bounds = array<i64: 1, 16, 128>}, {pipeline_mode = #tpu.pipeline_mode<synchronous>, transform_indices = @transform_3, window_bounds = array<i64: 128, 128>}, {pipeline_mode = #tpu.pipeline_mode<synchronous>, transform_indices = @transform_4, window_bounds = array<i64: 128, 128>}, {pipeline_mode = #tpu.pipeline_mode<synchronous>, transform_indices = @transform_5, window_bounds = array<i64: 1, 128>}, {transform_indices = @transform_6, window_bounds = array<i64: 1, 32, 128>}]} {
    %c0_i32 = arith.constant 0 : i32
    %0 = arith.cmpi eq, %arg2, %c0_i32 : i32
    %1 = arith.extui %0 : i1 to i32
    %c0_i32_0 = arith.constant 0 : i32
    %2 = arith.cmpi ne, %1, %c0_i32_0 : i32
    scf.if %2 {
      %c0_48 = arith.constant 0 : index
      %c0_49 = arith.constant 0 : index
      %c0_50 = arith.constant 0 : index
      %104 = vector.load %arg3[%c0_48, %c0_49, %c0_50] : memref<1x32x128xf32, #tpu.memory_space<vmem>>, vector<1x32x128xf32>
      %105 = vector.shape_cast %104 : vector<1x32x128xf32> to vector<32x128xf32>
      %c0_51 = arith.constant 0 : index
      %c0_52 = arith.constant 0 : index
      %106 = vector.load %arg6[%c0_51, %c0_52] : memref<128x128xf32, #tpu.memory_space<vmem>>, vector<128x128xf32>
      %cst_53 = arith.constant dense<0.000000e+00> : vector<32x128xf32>
      %107 = tpu.matmul %105, %106, %cst_53 {dimension_numbers = #tpu.dot_dimension_numbers<[1], [0], [0], [1], [0, 0, 1, 1], [], []>} : vector<32x128xf32>, vector<128x128xf32>, vector<32x128xf32> -> vector<32x128xf32>
      %c0_54 = arith.constant 0 : index
      %c0_55 = arith.constant 0 : index
      %108 = vector.load %arg10[%c0_54, %c0_55] : memref<32x128xf32, #tpu.memory_space<vmem>>, vector<32x128xf32>
      tpu.vector_store %arg10[%c0_54, %c0_55], %107 {strides = array<i32>} : memref<32x128xf32, #tpu.memory_space<vmem>>, vector<32x128xf32>,
      %cst_56 = arith.constant 0.000000e+00 : f32
      %109 = vector.broadcast %cst_56 : f32 to vector<32x128xf32>
      %c0_57 = arith.constant 0 : index
      %c0_58 = arith.constant 0 : index
      %110 = vector.load %arg11[%c0_57, %c0_58] : memref<32x128xf32, #tpu.memory_space<vmem>>, vector<32x128xf32>
      tpu.vector_store %arg11[%c0_57, %c0_58], %109 {strides = array<i32>} : memref<32x128xf32, #tpu.memory_space<vmem>>, vector<32x128xf32>,
      %cst_59 = arith.constant 0xFF800000 : f32
      %111 = vector.broadcast %cst_59 : f32 to vector<32x4xf32>
      %c0_60 = arith.constant 0 : index
      %c0_61 = arith.constant 0 : index
      %112 = vector.load %arg12[%c0_60, %c0_61] : memref<32x4xf32, #tpu.memory_space<vmem>>, vector<32x4xf32>
      tpu.vector_store %arg12[%c0_60, %c0_61], %111 {strides = array<i32>} : memref<32x4xf32, #tpu.memory_space<vmem>>, vector<32x4xf32>,
      %cst_62 = arith.constant 0.000000e+00 : f32
      %113 = vector.broadcast %cst_62 : f32 to vector<32x4xf32>
      %c0_63 = arith.constant 0 : index
      %c0_64 = arith.constant 0 : index
      %114 = vector.load %arg13[%c0_63, %c0_64] : memref<32x4xf32, #tpu.memory_space<vmem>>, vector<32x4xf32>
      tpu.vector_store %arg13[%c0_63, %c0_64], %113 {strides = array<i32>} : memref<32x4xf32, #tpu.memory_space<vmem>>, vector<32x4xf32>,
    } else {
    }
    %c0 = arith.constant 0 : index
    %c0_1 = arith.constant 0 : index
    %c0_2 = arith.constant 0 : index
    %3 = vector.load %arg4[%c0, %c0_1, %c0_2] : memref<1x16x128xf32, #tpu.memory_space<vmem>>, vector<1x16x128xf32>
    %4 = vector.shape_cast %3 : vector<1x16x128xf32> to vector<16x128xf32>
    %c0_3 = arith.constant 0 : index
    %c0_4 = arith.constant 0 : index
    %c0_5 = arith.constant 0 : index
    %5 = vector.load %arg5[%c0_3, %c0_4, %c0_5] : memref<1x16x128xf32, #tpu.memory_space<vmem>>, vector<1x16x128xf32>
    %6 = vector.shape_cast %5 : vector<1x16x128xf32> to vector<16x128xf32>
    %c0_6 = arith.constant 0 : index
    %c0_7 = arith.constant 0 : index
    %7 = vector.load %arg10[%c0_6, %c0_7] : memref<32x128xf32, #tpu.memory_space<vmem>>, vector<32x32xf32>
    %8 = vector.extract_strided_slice %4 {offsets = [0, 0], sizes = [16, 32], strides = [1, 1]} : vector<16x128xf32> to vector<16x32xf32>
    %9 = vector.extract_strided_slice %6 {offsets = [0, 0], sizes = [16, 32], strides = [1, 1]} : vector<16x128xf32> to vector<16x32xf32>
    %cst = arith.constant dense<0.000000e+00> : vector<32x16xf32>
    %10 = tpu.matmul %7, %8, %cst {dimension_numbers = #tpu.dot_dimension_numbers<[1], [1], [0], [0], [0, 0, 1, 0], [], []>} : vector<32x32xf32>, vector<16x32xf32>, vector<32x16xf32> -> vector<32x16xf32>
    %c0_8 = arith.constant 0 : index
    %c0_9 = arith.constant 0 : index
    %11 = vector.load %arg12[%c0_8, %c0_9] : memref<32x4xf32, #tpu.memory_space<vmem>>, vector<32x1xf32>
    %cst_10 = arith.constant dense<0xFF800000> : vector<32xf32>
    %12 = vector.multi_reduction <maximumf>, %10, %cst_10 [1] : vector<32x16xf32> to vector<32xf32>
    %13 = vector.shape_cast %12 : vector<32xf32> to vector<32x1xf32>
    %14 = arith.maximumf %11, %13 : vector<32x1xf32>
    %15 = arith.subf %11, %14 : vector<32x1xf32>
    %16 = math.exp %15 : vector<32x1xf32>
    %17 = vector.broadcast %14 : vector<32x1xf32> to vector<32x16xf32>
    %18 = arith.subf %10, %17 : vector<32x16xf32>
    %19 = math.exp %18 : vector<32x16xf32>
    %c0_11 = arith.constant 0 : index
    %c0_12 = arith.constant 0 : index
    %20 = vector.load %arg13[%c0_11, %c0_12] : memref<32x4xf32, #tpu.memory_space<vmem>>, vector<32x1xf32>
    %21 = arith.mulf %16, %20 : vector<32x1xf32>
    %cst_13 = arith.constant dense<0.000000e+00> : vector<32xf32>
    %22 = vector.multi_reduction <add>, %19, %cst_13 [1] : vector<32x16xf32> to vector<32xf32>
    %23 = vector.shape_cast %22 : vector<32xf32> to vector<32x1xf32>
    %24 = arith.addf %21, %23 : vector<32x1xf32>
    %cst_14 = arith.constant dense<0.000000e+00> : vector<32x32xf32>
    %25 = tpu.matmul %19, %9, %cst_14 {dimension_numbers = #tpu.dot_dimension_numbers<[1], [0], [0], [1], [0, 0, 1, 1], [], []>} : vector<32x16xf32>, vector<16x32xf32>, vector<32x32xf32> -> vector<32x32xf32>
    %26 = vector.shape_cast %16 : vector<32x1xf32> to vector<32x1xf32>
    %27 = vector.broadcast %26 : vector<32x1xf32> to vector<32x32xf32>
    %c0_15 = arith.constant 0 : index
    %c32 = arith.constant 32 : index
    %28 = vector.load %arg10[%c0_15, %c32] : memref<32x128xf32, #tpu.memory_space<vmem>>, vector<32x32xf32>
    %29 = vector.extract_strided_slice %4 {offsets = [0, 32], sizes = [16, 32], strides = [1, 1]} : vector<16x128xf32> to vector<16x32xf32>
    %30 = vector.extract_strided_slice %6 {offsets = [0, 32], sizes = [16, 32], strides = [1, 1]} : vector<16x128xf32> to vector<16x32xf32>
    %cst_16 = arith.constant dense<0.000000e+00> : vector<32x16xf32>
    %31 = tpu.matmul %28, %29, %cst_16 {dimension_numbers = #tpu.dot_dimension_numbers<[1], [1], [0], [0], [0, 0, 1, 0], [], []>} : vector<32x32xf32>, vector<16x32xf32>, vector<32x16xf32> -> vector<32x16xf32>
    %c0_17 = arith.constant 0 : index
    %c1 = arith.constant 1 : index
    %32 = vector.load %arg12[%c0_17, %c1] : memref<32x4xf32, #tpu.memory_space<vmem>>, vector<32x1xf32>
    %cst_18 = arith.constant dense<0xFF800000> : vector<32xf32>
    %33 = vector.multi_reduction <maximumf>, %31, %cst_18 [1] : vector<32x16xf32> to vector<32xf32>
    %34 = vector.shape_cast %33 : vector<32xf32> to vector<32x1xf32>
    %35 = arith.maximumf %32, %34 : vector<32x1xf32>
    %36 = arith.subf %32, %35 : vector<32x1xf32>
    %37 = math.exp %36 : vector<32x1xf32>
    %38 = vector.broadcast %35 : vector<32x1xf32> to vector<32x16xf32>
    %39 = arith.subf %31, %38 : vector<32x16xf32>
    %40 = math.exp %39 : vector<32x16xf32>
    %c0_19 = arith.constant 0 : index
    %c1_20 = arith.constant 1 : index
    %41 = vector.load %arg13[%c0_19, %c1_20] : memref<32x4xf32, #tpu.memory_space<vmem>>, vector<32x1xf32>
    %42 = arith.mulf %37, %41 : vector<32x1xf32>
    %cst_21 = arith.constant dense<0.000000e+00> : vector<32xf32>
    %43 = vector.multi_reduction <add>, %40, %cst_21 [1] : vector<32x16xf32> to vector<32xf32>
    %44 = vector.shape_cast %43 : vector<32xf32> to vector<32x1xf32>
    %45 = arith.addf %42, %44 : vector<32x1xf32>
    %cst_22 = arith.constant dense<0.000000e+00> : vector<32x32xf32>
    %46 = tpu.matmul %40, %30, %cst_22 {dimension_numbers = #tpu.dot_dimension_numbers<[1], [0], [0], [1], [0, 0, 1, 1], [], []>} : vector<32x16xf32>, vector<16x32xf32>, vector<32x32xf32> -> vector<32x32xf32>
    %47 = vector.shape_cast %37 : vector<32x1xf32> to vector<32x1xf32>
    %48 = vector.broadcast %47 : vector<32x1xf32> to vector<32x32xf32>
    %c0_23 = arith.constant 0 : index
    %c64 = arith.constant 64 : index
    %49 = vector.load %arg10[%c0_23, %c64] : memref<32x128xf32, #tpu.memory_space<vmem>>, vector<32x32xf32>
    %50 = vector.extract_strided_slice %4 {offsets = [0, 64], sizes = [16, 32], strides = [1, 1]} : vector<16x128xf32> to vector<16x32xf32>
    %51 = vector.extract_strided_slice %6 {offsets = [0, 64], sizes = [16, 32], strides = [1, 1]} : vector<16x128xf32> to vector<16x32xf32>
    %cst_24 = arith.constant dense<0.000000e+00> : vector<32x16xf32>
    %52 = tpu.matmul %49, %50, %cst_24 {dimension_numbers = #tpu.dot_dimension_numbers<[1], [1], [0], [0], [0, 0, 1, 0], [], []>} : vector<32x32xf32>, vector<16x32xf32>, vector<32x16xf32> -> vector<32x16xf32>
    %c0_25 = arith.constant 0 : index
    %c2 = arith.constant 2 : index
    %53 = vector.load %arg12[%c0_25, %c2] : memref<32x4xf32, #tpu.memory_space<vmem>>, vector<32x1xf32>
    %cst_26 = arith.constant dense<0xFF800000> : vector<32xf32>
    %54 = vector.multi_reduction <maximumf>, %52, %cst_26 [1] : vector<32x16xf32> to vector<32xf32>
    %55 = vector.shape_cast %54 : vector<32xf32> to vector<32x1xf32>
    %56 = arith.maximumf %53, %55 : vector<32x1xf32>
    %57 = arith.subf %53, %56 : vector<32x1xf32>
    %58 = math.exp %57 : vector<32x1xf32>
    %59 = vector.broadcast %56 : vector<32x1xf32> to vector<32x16xf32>
    %60 = arith.subf %52, %59 : vector<32x16xf32>
    %61 = math.exp %60 : vector<32x16xf32>
    %c0_27 = arith.constant 0 : index
    %c2_28 = arith.constant 2 : index
    %62 = vector.load %arg13[%c0_27, %c2_28] : memref<32x4xf32, #tpu.memory_space<vmem>>, vector<32x1xf32>
    %63 = arith.mulf %58, %62 : vector<32x1xf32>
    %cst_29 = arith.constant dense<0.000000e+00> : vector<32xf32>
    %64 = vector.multi_reduction <add>, %61, %cst_29 [1] : vector<32x16xf32> to vector<32xf32>
    %65 = vector.shape_cast %64 : vector<32xf32> to vector<32x1xf32>
    %66 = arith.addf %63, %65 : vector<32x1xf32>
    %cst_30 = arith.constant dense<0.000000e+00> : vector<32x32xf32>
    %67 = tpu.matmul %61, %51, %cst_30 {dimension_numbers = #tpu.dot_dimension_numbers<[1], [0], [0], [1], [0, 0, 1, 1], [], []>} : vector<32x16xf32>, vector<16x32xf32>, vector<32x32xf32> -> vector<32x32xf32>
    %68 = vector.shape_cast %58 : vector<32x1xf32> to vector<32x1xf32>
    %69 = vector.broadcast %68 : vector<32x1xf32> to vector<32x32xf32>
    %c0_31 = arith.constant 0 : index
    %c96 = arith.constant 96 : index
    %70 = vector.load %arg10[%c0_31, %c96] : memref<32x128xf32, #tpu.memory_space<vmem>>, vector<32x32xf32>
    %71 = vector.extract_strided_slice %4 {offsets = [0, 96], sizes = [16, 32], strides = [1, 1]} : vector<16x128xf32> to vector<16x32xf32>
    %72 = vector.extract_strided_slice %6 {offsets = [0, 96], sizes = [16, 32], strides = [1, 1]} : vector<16x128xf32> to vector<16x32xf32>
    %cst_32 = arith.constant dense<0.000000e+00> : vector<32x16xf32>
    %73 = tpu.matmul %70, %71, %cst_32 {dimension_numbers = #tpu.dot_dimension_numbers<[1], [1], [0], [0], [0, 0, 1, 0], [], []>} : vector<32x32xf32>, vector<16x32xf32>, vector<32x16xf32> -> vector<32x16xf32>
    %c0_33 = arith.constant 0 : index
    %c3 = arith.constant 3 : index
    %74 = vector.load %arg12[%c0_33, %c3] : memref<32x4xf32, #tpu.memory_space<vmem>>, vector<32x1xf32>
    %cst_34 = arith.constant dense<0xFF800000> : vector<32xf32>
    %75 = vector.multi_reduction <maximumf>, %73, %cst_34 [1] : vector<32x16xf32> to vector<32xf32>
    %76 = vector.shape_cast %75 : vector<32xf32> to vector<32x1xf32>
    %77 = arith.maximumf %74, %76 : vector<32x1xf32>
    %78 = arith.subf %74, %77 : vector<32x1xf32>
    %79 = math.exp %78 : vector<32x1xf32>
    %80 = vector.broadcast %77 : vector<32x1xf32> to vector<32x16xf32>
    %81 = arith.subf %73, %80 : vector<32x16xf32>
    %82 = math.exp %81 : vector<32x16xf32>
    %c0_35 = arith.constant 0 : index
    %c3_36 = arith.constant 3 : index
    %83 = vector.load %arg13[%c0_35, %c3_36] : memref<32x4xf32, #tpu.memory_space<vmem>>, vector<32x1xf32>
    %84 = arith.mulf %79, %83 : vector<32x1xf32>
    %cst_37 = arith.constant dense<0.000000e+00> : vector<32xf32>
    %85 = vector.multi_reduction <add>, %82, %cst_37 [1] : vector<32x16xf32> to vector<32xf32>
    %86 = vector.shape_cast %85 : vector<32xf32> to vector<32x1xf32>
    %87 = arith.addf %84, %86 : vector<32x1xf32>
    %cst_38 = arith.constant dense<0.000000e+00> : vector<32x32xf32>
    %88 = tpu.matmul %82, %72, %cst_38 {dimension_numbers = #tpu.dot_dimension_numbers<[1], [0], [0], [1], [0, 0, 1, 1], [], []>} : vector<32x16xf32>, vector<16x32xf32>, vector<32x32xf32> -> vector<32x32xf32>
    %89 = vector.shape_cast %79 : vector<32x1xf32> to vector<32x1xf32>
    %90 = vector.broadcast %89 : vector<32x1xf32> to vector<32x32xf32>
    %91 = tpu.concatenate %27, %48, %69, %90 in 1 : vector<32x32xf32>, vector<32x32xf32>, vector<32x32xf32>, vector<32x32xf32> -> vector<32x128xf32>
    %92 = tpu.concatenate %25, %46, %67, %88 in 1 : vector<32x32xf32>, vector<32x32xf32>, vector<32x32xf32>, vector<32x32xf32> -> vector<32x128xf32>
    %c0_39 = arith.constant 0 : index
    %c0_40 = arith.constant 0 : index
    %93 = vector.load %arg11[%c0_39, %c0_40] : memref<32x128xf32, #tpu.memory_space<vmem>>, vector<32x128xf32>
    %94 = arith.mulf %91, %93 : vector<32x128xf32>
    %95 = arith.addf %94, %92 : vector<32x128xf32>
    %c0_41 = arith.constant 0 : index
    %c0_42 = arith.constant 0 : index
    %96 = vector.load %arg11[%c0_41, %c0_42] : memref<32x128xf32, #tpu.memory_space<vmem>>, vector<32x128xf32>
    tpu.vector_store %arg11[%c0_41, %c0_42], %95 {strides = array<i32>} : memref<32x128xf32, #tpu.memory_space<vmem>>, vector<32x128xf32>,
    %97 = tpu.concatenate %14, %35, %56, %77 in 1 : vector<32x1xf32>, vector<32x1xf32>, vector<32x1xf32>, vector<32x1xf32> -> vector<32x4xf32>
    %c0_43 = arith.constant 0 : index
    %c0_44 = arith.constant 0 : index
    %98 = vector.load %arg12[%c0_43, %c0_44] : memref<32x4xf32, #tpu.memory_space<vmem>>, vector<32x4xf32>
    tpu.vector_store %arg12[%c0_43, %c0_44], %97 {strides = array<i32>} : memref<32x4xf32, #tpu.memory_space<vmem>>, vector<32x4xf32>,
    %99 = tpu.concatenate %24, %45, %66, %87 in 1 : vector<32x1xf32>, vector<32x1xf32>, vector<32x1xf32>, vector<32x1xf32> -> vector<32x4xf32>
    %c0_45 = arith.constant 0 : index
    %c0_46 = arith.constant 0 : index
    %100 = vector.load %arg13[%c0_45, %c0_46] : memref<32x4xf32, #tpu.memory_space<vmem>>, vector<32x4xf32>
    tpu.vector_store %arg13[%c0_45, %c0_46], %99 {strides = array<i32>} : memref<32x4xf32, #tpu.memory_space<vmem>>, vector<32x4xf32>,
    %c1_i32 = arith.constant 1 : i32
    %101 = arith.cmpi eq, %arg2, %c1_i32 : i32
    %102 = arith.extui %101 : i1 to i32
    %c0_i32_47 = arith.constant 0 : i32
    %103 = arith.cmpi ne, %102, %c0_i32_47 : i32
    scf.if %103 {
      %c0_48 = arith.constant 0 : index
      %c0_49 = arith.constant 0 : index
      %104 = vector.load %arg13[%c0_48, %c0_49] : memref<32x4xf32, #tpu.memory_space<vmem>>, vector<32x4xf32>
      %105 = tpu.reciprocal %104 {approx = true} : vector<32x4xf32> -> vector<32x4xf32>
      %106 = vector.extract_strided_slice %105 {offsets = [0, 0], sizes = [32, 1], strides = [1, 1]} : vector<32x4xf32> to vector<32x1xf32>
      %107 = vector.shape_cast %106 : vector<32x1xf32> to vector<32x1xf32>
      %108 = vector.broadcast %107 : vector<32x1xf32> to vector<32x32xf32>
      %109 = vector.extract_strided_slice %105 {offsets = [0, 1], sizes = [32, 1], strides = [1, 1]} : vector<32x4xf32> to vector<32x1xf32>
      %110 = vector.shape_cast %109 : vector<32x1xf32> to vector<32x1xf32>
      %111 = vector.broadcast %110 : vector<32x1xf32> to vector<32x32xf32>
      %112 = vector.extract_strided_slice %105 {offsets = [0, 2], sizes = [32, 1], strides = [1, 1]} : vector<32x4xf32> to vector<32x1xf32>
      %113 = vector.shape_cast %112 : vector<32x1xf32> to vector<32x1xf32>
      %114 = vector.broadcast %113 : vector<32x1xf32> to vector<32x32xf32>
      %115 = vector.extract_strided_slice %105 {offsets = [0, 3], sizes = [32, 1], strides = [1, 1]} : vector<32x4xf32> to vector<32x1xf32>
      %116 = vector.shape_cast %115 : vector<32x1xf32> to vector<32x1xf32>
      %117 = vector.broadcast %116 : vector<32x1xf32> to vector<32x32xf32>
      %118 = tpu.concatenate %108, %111, %114, %117 in 1 : vector<32x32xf32>, vector<32x32xf32>, vector<32x32xf32>, vector<32x32xf32> -> vector<32x128xf32>
      %c0_50 = arith.constant 0 : index
      %c0_51 = arith.constant 0 : index
      %119 = vector.load %arg11[%c0_50, %c0_51] : memref<32x128xf32, #tpu.memory_space<vmem>>, vector<32x128xf32>
      %120 = arith.mulf %119, %118 : vector<32x128xf32>
      %c0_52 = arith.constant 0 : index
      %c0_53 = arith.constant 0 : index
      %121 = vector.load %arg7[%c0_52, %c0_53] : memref<128x128xf32, #tpu.memory_space<vmem>>, vector<128x128xf32>
      %cst_54 = arith.constant dense<0.000000e+00> : vector<32x128xf32>
      %122 = tpu.matmul %120, %121, %cst_54 {dimension_numbers = #tpu.dot_dimension_numbers<[1], [0], [0], [1], [0, 0, 1, 1], [], []>} : vector<32x128xf32>, vector<128x128xf32>, vector<32x128xf32> -> vector<32x128xf32>
      %c0_55 = arith.constant 0 : index
      %c0_56 = arith.constant 0 : index
      %123 = vector.load %arg8[%c0_55, %c0_56] : memref<1x128xf32, #tpu.memory_space<vmem>>, vector<1x128xf32>
      %124 = vector.shape_cast %123 : vector<1x128xf32> to vector<128xf32>
      %125 = vector.shape_cast %124 : vector<128xf32> to vector<1x128xf32>
      %126 = vector.broadcast %125 : vector<1x128xf32> to vector<32x128xf32>
      %127 = arith.addf %122, %126 : vector<32x128xf32>
      %c0_57 = arith.constant 0 : index
      %c0_58 = arith.constant 0 : index
      %c0_59 = arith.constant 0 : index
      %128 = vector.load %arg9[%c0_57, %c0_58, %c0_59] : memref<1x32x128xf32, #tpu.memory_space<vmem>>, vector<1x32x128xf32>
      %129 = vector.shape_cast %128 : vector<1x32x128xf32> to vector<32x128xf32>
      %130 = vector.shape_cast %127 : vector<32x128xf32> to vector<1x32x128xf32>
      tpu.vector_store %arg9[%c0_57, %c0_58, %c0_59], %130 {strides = array<i32>} : memref<1x32x128xf32, #tpu.memory_space<vmem>>, vector<1x32x128xf32>,
    } else {
    }
    return
  }
  func.func @transform_0(%arg0: i32, %arg1: i32, %arg2: i32) -> (i32, i32, i32) {
    %c0_i32 = arith.constant 0 : i32
    %c0_i32_0 = arith.constant 0 : i32
    return %arg0, %arg1, %c0_i32 : i32, i32, i32
  }
  func.func @transform_1(%arg0: i32, %arg1: i32, %arg2: i32) -> (i32, i32, i32) {
    %c0_i32 = arith.constant 0 : i32
    %c0_i32_0 = arith.constant 0 : i32
    return %arg0, %arg2, %c0_i32 : i32, i32, i32
  }
  func.func @transform_2(%arg0: i32, %arg1: i32, %arg2: i32) -> (i32, i32, i32) {
    %c0_i32 = arith.constant 0 : i32
    %c0_i32_0 = arith.constant 0 : i32
    return %arg0, %arg2, %c0_i32 : i32, i32, i32
  }
  func.func @transform_3(%arg0: i32, %arg1: i32, %arg2: i32) -> (i32, i32) {
    %c0_i32 = arith.constant 0 : i32
    %c0_i32_0 = arith.constant 0 : i32
    %c0_i32_1 = arith.constant 0 : i32
    return %c0_i32, %c0_i32_0 : i32, i32
  }
  func.func @transform_4(%arg0: i32, %arg1: i32, %arg2: i32) -> (i32, i32) {
    %c0_i32 = arith.constant 0 : i32
    %c0_i32_0 = arith.constant 0 : i32
    %c0_i32_1 = arith.constant 0 : i32
    return %c0_i32, %c0_i32_0 : i32, i32
  }
  func.func @transform_5(%arg0: i32, %arg1: i32, %arg2: i32) -> (i32, i32) {
    %c0_i32 = arith.constant 0 : i32
    %c0_i32_0 = arith.constant 0 : i32
    %c0_i32_1 = arith.constant 0 : i32
    return %c0_i32, %c0_i32_0 : i32, i32
  }
  func.func @transform_6(%arg0: i32, %arg1: i32, %arg2: i32) -> (i32, i32, i32) {
    %c0_i32 = arith.constant 0 : i32
    %c0_i32_0 = arith.constant 0 : i32
    return %arg0, %arg1, %c0_i32 : i32, i32, i32
  }
}

</mosaic_0001>

<bundles_post_ra>
// kernel: tpu_custom_call.1
= control target key start
LH: loop header
LB: loop body
LE: loop exit
PB: predicated region body
PF: predicated region fallthrough
CT: control target
= control target key end

     0   :  { %s4237_s0 = inlined_call_operand.hbm [shape: f32[2,64,128], index: 0, kind: input, shape index: {}]   ;;  %s4238_s1 = inlined_call_operand.hbm [shape: f32[2,32,128], index: 1, kind: input, shape index: {}]   ;;  %s4239_s2 = inlined_call_operand.hbm [shape: f32[2,32,128], index: 2, kind: input, shape index: {}]   ;;  %s4240_s3 = inlined_call_operand.hbm [shape: f32[128,128], index: 3, kind: input, shape index: {}]   ;;  %s4241_s4 = inlined_call_operand.hbm [shape: f32[128,128], index: 4, kind: input, shape index: {}]   ;;  %s4242_s5 = inlined_call_operand.vmem [shape: f32[1,128], index: 5, kind: input, shape index: {}]   ;;  %s4243_s6 = inlined_call_operand.hbm [shape: f32[2,64,128], index: 6, kind: output, shape index: {}]  }
   0x1   :  { %4272 = sst [smem:[#allocation35_spill]] %s4238_s1 }
   0x2   :  { %4273 = sst [smem:[#allocation36_spill]] %s4239_s2 }
   0x3   :  { %4274 = sst [smem:[#allocation37_spill]] %s4240_s3 }
   0x4   :  { %4275 = sst [smem:[#allocation38_spill]] %s4241_s4 }
   0x5   :  { %4276 = sst [smem:[#allocation39_spill]] %s4242_s5 }
   0x6   :  { %4277 = sst [smem:[#allocation40_spill]] %s4243_s6 }
   0x7   :  { %11 = vsyncpa [#allocation7], 0 }
   0x8   :  { %13 = vsyncpa [#allocation7 + $0x1], 0 }
   0x9   :  { %14 = vsyncpa [#allocation10], 0 }
   0xa   :  { %16 = vsyncpa [#allocation10 + $0x1], 0 }
   0xb   :  { %17 = vsyncpa [#allocation13], 0 }
   0xc   :  { %18 = vsyncpa [#allocation8], 0 }
   0xd   :  { %20 = vsyncpa [#allocation8 + $0x1], 0  ;;  %s3296_s21 = smov 0   ;;  %s3298_s22 = smov 0  }
   0xe   :  { %s3300_s23 = smov 0   ;;  %s3302_s24 = smov 0  }
   0xf   :  { %s3304_s25 = smov 0   ;;  %s3306_s26 = smov 0  }
  0x10   :  { %s3308_s27 = smov 0   ;;  %s3310_s28 = smov 0  }
  0x11   :  { %s3312_s29 = smov 0   ;;  %s3314_s30 = smov 0  }
  0x12   :  { %s3316_s7 = smov 0   ;;  %s3318_s8 = smov 0  }
  0x13   :  { %s3320_s9 = smov 0  }
  0x14 LB: > { %4278 = sst [smem:[#allocation20_spill]] %s3192_s22  ;;  %s3360_s10 = sadd.s32 4294967295, %s3236_s9   ;;  %s3236_s9 = sphi %s3320_s9, %s26_s9   ;;  %s3232_s8 = sphi %s3318_s8, %s4352_s8   ;;  %s3228_s7 = sphi %s3316_s7, %s4351_s7   ;;  %s3224_s30 = sphi %s3314_s30, %s4350_s30   ;;  %s3220_s29 = sphi %s3312_s29, %s4349_s29   ;;  %s3216_s28 = sphi %s3310_s28, %s4342_s28   ;;  %s3212_s27 = sphi %s3308_s27, %s4348_s27   ;;  %s3208_s26 = sphi %s3306_s26, %s4347_s26   ;;  %s3204_s25 = sphi %s3304_s25, %s4346_s25   ;;  %s3200_s24 = sphi %s3302_s24, %s4341_s24   ;;  %s3196_s23 = sphi %s3300_s23, %s4345_s23   ;;  %s3192_s22 = sphi %s3298_s22, %s4344_s22   ;;  %s3188_s21 = sphi %s3296_s21, %s4340_s21  }
  0x15   : > { %4279 = sst [smem:[#allocation21_spill]] %s3200_s24  ;;  %s2314_s11 = sadd.s32 4294967294, %s3236_s9  }
  0x16   : > { %4280 = sst [smem:[#allocation22_spill]] %s3204_s25  ;;  %p67_p0 = scmp.ne.s32.totalorder %s3204_s25, %s3200_s24 }
  0x17   : > { %4281 = sst [smem:[#allocation23_spill]] %s3212_s27  ;;  %p4256_p1 = scmp.eq.s32.totalorder %s3360_s10, 0 }
  0x18   : > { %4282 = sst [smem:[#allocation24_spill]] %s3216_s28  ;;  %p95_p2 = scmp.ne.s32.totalorder %s3192_s22, %s3188_s21 }
  0x19   : > { %4283 = sst [smem:[#allocation25_spill]] %s3220_s29  ;;  %p3370_p4 = por %p4256_p1, %p67_p0 }
  0x1a   : > { %4284 = sst [smem:[#allocation26_spill]] %s3228_s7  ;;  %p218_p5 = scmp.eq.s32.totalorder %s2314_s11, 7 }
  0x1b   : > { %4285 = sst [smem:[#allocation27_spill]] %s3360_s10  ;;  %p3376_p6 = por %p95_p2, %p4256_p1 }
  0x1c   : > { %s4286_s12 = scalar_select %p3370_p4, 1, 0 }
  0x1d   : > { %s4288_s13 = scalar_select %p3376_p6, 1, 0 }
  0x1e   : > { %4287 = sst [smem:[#allocation28_spill]] %s4286_s12  ;;  %p2315_p7 = scmp.ge.s32.totalorder %s3236_s9, 1 }
  0x1f   : > { %4289 = sst [smem:[#allocation29_spill]] %s4288_s13  ;;  %p3381_p8 = por %p218_p5, %p67_p0 }
  0x20   : > { %p225_p9 = scmp.lt.s32.totalorder %s3236_s9, 9  ;;  %s3238_s16 = smov [#allocation12]  }
  0x21   : > { %s4290_s14 = scalar_select %p3381_p8, 1, 0 }
  0x22   : > { %p3386_p10 = pnand %p2315_p7, %p225_p9  ;;  %s237_s17 = sshll.u32 %s3238_s16, 4  ;;  %s238_s17 = int_to_ptr.vmem [resolvable:$true] %s237_s17 }
  0x23   : > { %4291 = sst [smem:[#allocation30_spill]] %s4290_s14  ;;  %s2967_s19 = scalar_lea.vmem %s238_s17, 2048 }
  0x24   : > { %s4292_s15 = scalar_select %p3386_p10, 1, 0 }
  0x25   : > { %p2711_p11 = pneg %p3386_p10  ;;  %p2968_p0 = scmp.ne.s32.totalorder %s238_s17, %s2967_s19 }
  0x26   : > { %4293 = sst [smem:[#allocation31_spill]] %s4292_s15  ;;  %p2975_p7 = scmp.lt.s32.totalorder %s238_s17, %s238_s17 }
  0x27   : > { %p3394_p12 = pnand %p2711_p11, %p4256_p1  ;;  %p2976_p9 = scmp.lt.s32.totalorder %s2967_s19, %s2967_s19 }
  0x29   : > { %p4259_p13 = pneg %p3394_p12  ;;  %p2977_p3 = por %p2976_p9, %p2975_p7 }
  0x2b   : > { %p2970_p2 = pnand %p2968_p0, %p4259_p13 }
  0x2d   : > { %p2971_p5 = pneg %p2970_p2 }
  0x2f   : > { %p2978_p8 = pnand %p2977_p3, %p2971_p5 }
  0x31   : > { %2981 = shalt.err (!%p2978_p8)
}
  0x32   : > { %s4247_s20 = smov 128   ;;  %s4249_s21 = smov 8  }
  0x33   : > { %s4295_s3 = sld [smem:[#allocation37_spill]]  ;;  %s38_s19 = sadd.s32 1, %s3224_s30 }
  0x34   : > { %p3412_p3 = scmp.ge.s32.totalorder %s38_s19, 2  ;;  %p4258_p8 = scmp.eq.s32.totalorder %s3236_s9, 0 }
  0x35   : > { %p89_p11 = scmp.ne.s32.totalorder %s3196_s23, %s3192_s22  ;;  %p4257_p0 = scmp.lt.s32.totalorder %s3236_s9, 8 }
  0x36   : > { %s4354_s19 = smov (%p3412_p3, %s38_s19), 0  ;;  %s290_s11 = sand.u32 1, %s3236_s9  }
  0x37   : > { %p91_p2 = por %p89_p11, %p4258_p8  ;;  %s2324_s16 = sshll.u32 %s3224_s30, 1 }
  0x38   : > { %s4297_s1 = sld [smem:[#allocation35_spill]]  ;;  %s3241_s27 = smov [#allocation9]  }
  0x39   : > { %2714 = dma.hbm_to_vmem [thread:$0]  (!%p3394_p12), %s4295_s3, 2048, %s238_s17, [#allocation13], %s4247_s20, %s4247_s20, %s4249_s21  }
  0x3a   : > { %s292_s17 = sand.u32 1, %s3196_s23   ;;  %s2325_s21 = sshll.u32 %s3232_s8, 2 }
  0x3b   : > { %s2323_s20 = sshll.u32 %s292_s17, 4  ;;  %s300_s3 = sadd.s32 %s2325_s21, %s2324_s16 }
  0x3c   : > { %s2326_s28 = sshll.u32 %s300_s3, 7  ;;  %s294_s24 = scalar_lea.vmem [#allocation9], %s2323_s20 }
  0x3d   : > { %s303_s5 = sshll.u32 %s294_s24, 4  ;;  %p3439_p5 = pnand %p4257_p0, %p91_p2  ;;  %s304_s5 = int_to_ptr.vmem [resolvable:$true] %s303_s5 }
  0x3e   : > { %s302_s13 = scalar_lea.hbm %s4297_s1, %s2326_s28  ;;  %s4299_s2 = sld [smem:[#allocation36_spill]] }
  0x3f   : > { %s317_s3 = scalar_lea.vmem [#allocation11], %s2323_s20  ;;  %s3450_s24 = scalar_lea.sflag [#allocation10], %s290_s11 }
  0x40   : > { %s326_s21 = sshll.u32 %s317_s3, 4  ;;  %p4260_p7 = pneg %p3439_p5  ;;  %s3448_s21 = int_to_ptr.vmem [resolvable:$true] %s326_s21 }
  0x41   : > { %s2995_s6 = scalar_lea.vmem %s304_s5, 256  ;;  %s3000_s29 = sshll.u32 %s3241_s27, 4  ;;  %s3001_s29 = int_to_ptr.vmem [resolvable:$false] %s3000_s29 }
  0x42   : > { %p2996_p9 = scmp.ne.s32.totalorder %s304_s5, %s2995_s6  ;;  %s3002_s12 = scalar_lea.vmem %s3001_s29, 512 }
  0x43   : > { %p3003_p1 = scmp.lt.s32.totalorder %s304_s5, %s3001_s29  ;;  %p3004_p0 = scmp.lt.s32.totalorder %s3002_s12, %s2995_s6 }
  0x44   : > { %s3446_s17 = scalar_lea.hbm %s4299_s2, %s2326_s28  ;;  %p2998_p11 = pnand %p2996_p9, %p4260_p7 }
  0x45   : > { %4300 = sst [smem:[#allocation32_spill]] %s3446_s17  ;;  %p3005_p8 = por %p3004_p0, %p3003_p1 }
  0x46   : > { %p2999_p2 = pneg %p2998_p11 }
  0x48   : > { %p3006_p13 = pnand %p3005_p8, %p2999_p2 }
  0x4a   : > { %3009 = shalt.err (!%p3006_p13)
}
  0x4b   : > { %s4301_s28 = smov 8   ;;  %s4302_s20 = smov 128  }
  0x4c   : > { %2724 = dma.hbm_to_vmem [thread:$0]  (!%p3439_p5), %s302_s13, 256, %s304_s5, %s3450_s24, %s4302_s20, %s4302_s20, %s4301_s28  }
  0x4d   : > { %s3242_s11 = smov [#allocation14]   ;;  %p4303_p11 = pneg %p3394_p12 }
  0x4e   : > { %s250_s16 = sshll.u32 %s3242_s11, 4  ;;  %s251_s16 = int_to_ptr.vmem [resolvable:$true] %s250_s16 }
  0x4f   : > { %s3021_s3 = scalar_lea.vmem %s251_s16, 2048  ;;  %p3029_p1 = scmp.lt.s32.totalorder %s251_s16, %s251_s16 }
  0x50   : > { %p3022_p9 = scmp.ne.s32.totalorder %s251_s16, %s3021_s3  ;;  %p3030_p8 = scmp.lt.s32.totalorder %s3021_s3, %s3021_s3 }
  0x52   : > { %p3024_p7 = pnand %p3022_p9, %p4303_p11  ;;  %p3031_p13 = por %p3030_p8, %p3029_p1 }
  0x54   : > { %p3025_p6 = pneg %p3024_p7 }
  0x56   : > { %p3032_p0 = pnand %p3031_p13, %p3025_p6 }
  0x58   : > { %3035 = shalt.err (!%p3032_p0)
}
  0x59   : > { %s4304_s4 = sld [smem:[#allocation38_spill]]  ;;  %s41_s18 = sadd.s32 1, %s3228_s7 }
  0x5a   : > { %s4356_s18 = smov (!%p3412_p3, %s41_s18), %s3228_s7  ;;  %s54_s6 = sadd.s32 1, %s3208_s26 }
  0x5b   : > { %p61_p6 = scmp.ne.s32.totalorder %s3208_s26, %s3204_s25  ;;  %p43_p7 = scmp.ge.s32.totalorder %s4356_s18, 2 }
  0x5c   : > { %s4267_s27 = sand.u32 1, %s3208_s26   ;;  %p4305_p2 = scmp.eq.s32.totalorder %s3236_s9, 0 }
  0x5d   : > { %p4307_p11 = scmp.eq.s32.totalorder %s3360_s10, 7  ;;  %s4358_s18 = smov (%p43_p7, %s4356_s18), 0 }
  0x5e   : > { %p3484_p9 = por %p4305_p2, %p61_p6  ;;  %4310 = sst [smem:[#allocation34_spill]] %s4358_s18 }
  0x5f   : > { %2717 = dma.hbm_to_vmem [thread:$0]  (!%p3394_p12), %s4304_s4, 2048, %s251_s16, [#allocation13], %s4302_s20, %s4302_s20, %s4301_s28  }
  0x60   : > { %p3490_p1 = por %p4307_p11, %p61_p6  ;;  %s4311_s14 = sadd.s32 1, %s3232_s8 }
  0x61   : > { %s4360_s14 = smov (!%p43_p7, %s4311_s14), %s3232_s8  ;;  %s50_s11 = ssub.s32 %s3228_s7, %s4358_s18 }
  0x62   : > { %s4308_s12 = scalar_select %p3490_p1, 1, 0 }
  0x63   : > { %p47_p12 = scmp.ge.s32.totalorder %s4360_s14, 2  ;;  %s2319_s16 = sshll.u32 %s4267_s27, 5 }
  0x64   : > { %4309 = sst [smem:[#allocation33_spill]] %s4308_s12  ;;  %s2320_s3 = sshll.u32 %s3228_s7, 2 }
  0x65   : > { %s4362_s14 = smov (%p47_p12, %s4360_s14), 0  ;;  %s2321_s5 = sshll.u32 %s3232_s8, 3 }
  0x66   : > { %s271_s13 = scalar_lea.vmem [#allocation6], %s2319_s16  ;;  %s49_s2 = ssub.s32 %s3232_s8, %s4362_s14 }
  0x67   : > { %s280_s1 = sshll.u32 %s271_s13, 4  ;;  %s277_s4 = sadd.s32 %s2321_s5, %s2320_s3  ;;  %s3512_s1 = int_to_ptr.vmem [resolvable:$true] %s280_s1 }
  0x68   : > { %s51_s18 = sor.u32 %s50_s11, %s49_s2  ;;  %s4312_s12 = ssub.s32 %s3224_s30, %s4354_s19 }
  0x69   : > { %s79_s10 = sor.u32 %s4312_s12, %s49_s2  ;;  %p52_p3 = scmp.eq.s32.totalorder %s51_s18, 0 }
  0x6a   : > { %p80_p8 = scmp.eq.s32.totalorder %s79_s10, 0  ;;  %s2322_s27 = sshll.u32 %s277_s4, 7 }
  0x6b   : > { %s3515_s7 = scalar_select %p52_p3, %s3208_s26, %s54_s6  }
  0x6c   : > { %s4313_s25 = sadd.s32 1, %s3196_s23  ;;  %s3525_s13 = scalar_lea.hbm %s4237_s0, %s2322_s27 }
  0x6d   : > { %s3520_s15 = scalar_select %p80_p8, %s3196_s23, %s4313_s25  }
  0x6e   : > { %p4314_p13 = scmp.lt.s32.totalorder %s3236_s9, 8  ;;  %s3049_s10 = scalar_lea.vmem %s3448_s21, 256 }
  0x6f   : > { %p3050_p6 = scmp.ne.s32.totalorder %s3448_s21, %s3049_s10  ;;  %p4316_p7 = pneg %p3439_p5 }
  0x70   : > { %p3531_p0 = pnand %p4314_p13, %p3484_p9  ;;  %s3243_s4 = smov [#allocation11]  }
  0x71   : > { %p3052_p2 = pnand %p3050_p6, %p4316_p7  ;;  %s3054_s25 = sshll.u32 %s3243_s4, 4  ;;  %s3055_s25 = int_to_ptr.vmem [resolvable:$false] %s3054_s25 }
  0x72   : > { %s3056_s18 = scalar_lea.vmem %s3055_s25, 512  ;;  %p3057_p12 = scmp.lt.s32.totalorder %s3448_s21, %s3055_s25 }
  0x73   : > { %p3053_p11 = pneg %p3052_p2  ;;  %p3058_p3 = scmp.lt.s32.totalorder %s3056_s18, %s3049_s10 }
  0x75   : > { %p3059_p8 = por %p3058_p3, %p3057_p12 }
  0x77   : > { %p3060_p1 = pnand %p3059_p8, %p3053_p11 }
  0x79   : > { %3063 = shalt.err (!%p3060_p1)
}
  0x7a   : > { %s4317_s17 = sld [smem:[#allocation32_spill]]  ;;  %s4318_s6 = sand.u32 1, %s3208_s26  }
  0x7b   : > { %s268_s27 = scalar_lea.sflag [#allocation7], %s4318_s6  ;;  %p3066_p9 = pneg %p3531_p0 }
  0x7c   : > { %s3077_s29 = scalar_lea.vmem %s3512_s1, 512  ;;  %s3244_s22 = smov [#allocation6]  }
  0x7d   : > { %p3078_p1 = scmp.ne.s32.totalorder %s3512_s1, %s3077_s29  ;;  %s3082_s12 = sshll.u32 %s3244_s22, 4  ;;  %s3083_s12 = int_to_ptr.vmem [resolvable:$false] %s3082_s12 }
  0x7e   : > { %s3084_s11 = scalar_lea.vmem %s3083_s12, 1024  ;;  %p3085_p7 = scmp.lt.s32.totalorder %s3512_s1, %s3083_s12 }
  0x7f   : > { %p3080_p13 = pnand %p3078_p1, %p3066_p9  ;;  %p3086_p2 = scmp.lt.s32.totalorder %s3084_s11, %s3077_s29 }
  0x80   : > { %2727 = dma.hbm_to_vmem [thread:$0]  (!%p3439_p5), %s4317_s17, 256, %s3448_s21, %s3450_s24, %s4302_s20, %s4302_s20, %s4301_s28  }
  0x81   : > { %p3081_p6 = pneg %p3080_p13  ;;  %p3087_p11 = por %p3086_p2, %p3085_p7 }
  0x83   : > { %p3088_p12 = pnand %p3087_p11, %p3081_p6 }
  0x85   : > { %3091 = shalt.err (!%p3088_p12)
}
  0x86   : > { %2721 = dma.hbm_to_vmem [thread:$0]  (!%p3531_p0), %s3525_s13, 512, %s3512_s1, %s268_s27, %s4302_s20, %s4302_s20, %s4301_s28  }
  0x87   : > { %338 = sbr.rel (%p3386_p10) target bundleno = 2162 (0x872), region = 44  ;;  %s4320_s24 = sld [smem:[#allocation22_spill]] (!%p3386_p10) }
  0x8d   : > { %s3566_s5 = sand.u32 1, %s4320_s24  }
  0x8e   : > { %s2332_s16 = sshll.u32 %s3566_s5, 5  ;;  %s341_s10 = scalar_lea.sflag [#allocation7], %s3566_s5 }
  0x8f   : > { %s3570_s4 = scalar_lea.vmem [#allocation6], %s2332_s16 }
  0x90   : > { %3171 = dma.done.wait (%p3370_p4), %s341_s10, 512  }
  0x91   : > { %3173 = vsyncadd (%p3370_p4), %s341_s10, 4294966784  ;;  %s4322_s2 = sld [smem:[#allocation27_spill]] }
  0x92   : > { %s4323_s1 = sld [smem:[#allocation20_spill]] }
  0x93   : > { %s4324_s28 = sld [smem:[#allocation29_spill]] }
  0x97   : > { %s349_s20 = sand.u32 1, %s4322_s2  }
  0x98   : > { %s351_s13 = sand.u32 1, %s4323_s1   ;;  %s350_s18 = scalar_lea.sflag [#allocation10], %s349_s20 }
  0x99   : > { %s3578_s25 = sshll.u32 %s351_s13, 4  ;;  %p4325_p10 = scmp.ne.s32.totalorder %s4324_s28, 0 }
  0x9a   : > { %s353_s17 = scalar_lea.vmem [#allocation9], %s3578_s25 }
  0x9b   : > { %3175 = dma.done.wait (%p4325_p10), %s350_s18, 512  }
  0x9c   : > { %3177 = vsyncadd (%p4325_p10), %s350_s18, 4294966784  ;;  %s362_s6 = scalar_lea.vmem [#allocation11], %s3578_s25  ;;  %p4326_p5 = scmp.eq.s32.totalorder %s4322_s2, 0 }
  0x9e   : > { %3179 = dma.done.wait (%p4326_p5), [#allocation13], 4096   ;;  %p4327_p4 = pmov %p4326_p5 }
  0x9f   : > { %s3590_s27 = scalar_lea.vmem [#allocation15], %s2332_s16  ;;  %s4328_s29 = sld [smem:[#allocation23_spill]] }
  0xa0   : > { %3181 = vsyncadd (%p4327_p4), [#allocation13], 4294963200 }
  0xa5   : > { %p2338_p0 = scmp.ne.s32.totalorder %s4328_s29, 0 }
  0xa7   : > { %416 = sbr.rel (%p2338_p0) target bundleno = 402 (0x192), region = 68 }
  0xac   : > { %v436_v0 = vld [vmem:[#allocation12 + $0x78] sm:$0xff]  ;;  %v435_v1 = vld [vmem:[#allocation12 + $0x70] sm:$0xff]  ;;  %v434_v2 = vld [vmem:[#allocation12 + $0x68] sm:$0xff]  ;;  %vm530_vm0 = vcmask 31744   ;;  %v3245_v20 = vmov 0.0   ;;  %v3246_v21 = vmov -inf  }
  0xad   : > { %2475 = vmatprep.subr.mxu0 %v436_v0  ;;  %2631 = vmatprep.subr.mxu1 %v436_v0  ;;  %v433_v3 = vld [vmem:[#allocation12 + $0x60] sm:$0xff]  ;;  %v432_v4 = vld [vmem:[#allocation12 + $0x58] sm:$0xff]  ;;  %v431_v5 = vld [vmem:[#allocation12 + $0x50] sm:$0xff]  ;;  %526 = vst [vmem:[#allocation3] sm:$0xff] %v3245_v20 }
  0xae   : > { %2476 = vmatpush3.msra.mxu0 %v436_v0  ;;  %2647 = vmatpush3.msra.mxu1 %v436_v0  ;;  %v430_v6 = vld [vmem:[#allocation12 + $0x48] sm:$0xff]  ;;  %v429_v7 = vld [vmem:[#allocation12 + $0x40] sm:$0xff]  ;;  %v428_v8 = vld [vmem:[#allocation12 + $0x38] sm:$0xff]  ;;  %527 = vst [vmem:[#allocation3 + $0x18] sm:$0xff] %v3245_v20 }
  0xaf   : > { %2477 = vmatprep.subr.mxu0 %v435_v1  ;;  %2632 = vmatprep.subr.mxu1 %v435_v1  ;;  %v427_v9 = vld [vmem:[#allocation12 + $0x30] sm:$0xff]  ;;  %v426_v10 = vld [vmem:[#allocation12 + $0x28] sm:$0xff]  ;;  %v425_v11 = vld [vmem:[#allocation12 + $0x20] sm:$0xff]  ;;  %528 = vst [vmem:[#allocation3 + $0x8] sm:$0xff] %v3245_v20 }
  0xb0   : > { %2478 = vmatpush3.msra.mxu0 %v435_v1  ;;  %2648 = vmatpush3.msra.mxu1 %v435_v1  ;;  %v424_v12 = vld [vmem:[#allocation12 + $0x18] sm:$0xff]  ;;  %v423_v13 = vld [vmem:[#allocation12 + $0x10] sm:$0xff]  ;;  %v422_v14 = vld [vmem:[#allocation12 + $0x8] sm:$0xff]  ;;  %529 = vst [vmem:[#allocation3 + $0x10] sm:$0xff] %v3245_v20 }
  0xb1   : > { %2479 = vmatprep.subr.mxu0 %v434_v2  ;;  %2633 = vmatprep.subr.mxu1 %v434_v2  ;;  %v421_v15 = vld [vmem:[#allocation12] sm:$0xff]  ;;  %v419_v17 = vld [vmem:[%s3570_s4 + $0x10] sm:$0xff]  ;;  %v418_v18 = vld [vmem:[%s3570_s4 + $0x8] sm:$0xff]  ;;  %531 = vst.msk [vmem:[#allocation4] sm:$0xff] %vm530_vm0, %v3246_v21 }
  0xb2   : > { %2480 = vmatpush3.msra.mxu0 %v434_v2  ;;  %2649 = vmatpush3.msra.mxu1 %v434_v2  ;;  %v417_v16 = vld [vmem:[%s3570_s4] sm:$0xff]  ;;  %v420_v19 = vld [vmem:[%s3570_s4 + $0x18] sm:$0xff]  ;;  %532 = vst.msk [vmem:[#allocation4 + $0x8] sm:$0xff] %vm530_vm0, %v3246_v21  ;;  %533 = vst.msk [vmem:[#allocation4 + $0x10] sm:$0xff] %vm530_vm0, %v3246_v21 }
  0xb3   : > { %2481 = vmatprep.subr.mxu0 %v433_v3  ;;  %2634 = vmatprep.subr.mxu1 %v433_v3  ;;  %534 = vst.msk [vmem:[#allocation4 + $0x18] sm:$0xff] %vm530_vm0, %v3246_v21  ;;  %535 = vst.msk [vmem:[#allocation5] sm:$0xff] %vm530_vm0, %v3245_v20 }
  0xb4   : > { %2482 = vmatpush3.msra.mxu0 %v433_v3  ;;  %2650 = vmatpush3.msra.mxu1 %v433_v3  ;;  %536 = vst.msk [vmem:[#allocation5 + $0x8] sm:$0xff] %vm530_vm0, %v3245_v20  ;;  %537 = vst.msk [vmem:[#allocation5 + $0x10] sm:$0xff] %vm530_vm0, %v3245_v20 }
  0xb5   : > { %2483 = vmatprep.subr.mxu0 %v432_v4  ;;  %2635 = vmatprep.subr.mxu1 %v432_v4  ;;  %538 = vst.msk [vmem:[#allocation5 + $0x18] sm:$0xff] %vm530_vm0, %v3245_v20 }
  0xb6   : > { %2484 = vmatpush3.msra.mxu0 %v432_v4  ;;  %2651 = vmatpush3.msra.mxu1 %v432_v4 }
  0xb7   : > { %2485 = vmatprep.subr.mxu0 %v431_v5  ;;  %2636 = vmatprep.subr.mxu1 %v431_v5 }
  0xb8   : > { %2486 = vmatpush3.msra.mxu0 %v431_v5  ;;  %2652 = vmatpush3.msra.mxu1 %v431_v5 }
  0xb9   : > { %2487 = vmatprep.subr.mxu0 %v430_v6  ;;  %2637 = vmatprep.subr.mxu1 %v430_v6 }
  0xba   : > { %2488 = vmatpush3.msra.mxu0 %v430_v6  ;;  %2653 = vmatpush3.msra.mxu1 %v430_v6 }
  0xbb   : > { %2489 = vmatprep.subr.mxu0 %v429_v7  ;;  %2638 = vmatprep.subr.mxu1 %v429_v7 }
  0xbc   : > { %2490 = vmatpush3.msra.mxu0 %v429_v7  ;;  %2654 = vmatpush3.msra.mxu1 %v429_v7 }
  0xbd   : > { %2491 = vmatprep.subr.mxu0 %v428_v8  ;;  %2639 = vmatprep.subr.mxu1 %v428_v8 }
  0xbe   : > { %2492 = vmatpush3.msra.mxu0 %v428_v8  ;;  %2655 = vmatpush3.msra.mxu1 %v428_v8 }
  0xbf   : > { %2493 = vmatprep.subr.mxu0 %v427_v9  ;;  %2640 = vmatprep.subr.mxu1 %v427_v9 }
  0xc0   : > { %2494 = vmatpush3.msra.mxu0 %v427_v9  ;;  %2656 = vmatpush3.msra.mxu1 %v427_v9 }
  0xc1   : > { %2495 = vmatprep.subr.mxu0 %v426_v10  ;;  %2641 = vmatprep.subr.mxu1 %v426_v10 }
  0xc2   : > { %2496 = vmatpush3.msra.mxu0 %v426_v10  ;;  %2657 = vmatpush3.msra.mxu1 %v426_v10 }
  0xc3   : > { %2497 = vmatprep.subr.mxu0 %v425_v11  ;;  %2642 = vmatprep.subr.mxu1 %v425_v11 }
  0xc4   : > { %2498 = vmatpush3.msra.mxu0 %v425_v11  ;;  %2658 = vmatpush3.msra.mxu1 %v425_v11 }
  0xc5   : > { %2499 = vmatprep.subr.mxu0 %v424_v12  ;;  %2643 = vmatprep.subr.mxu1 %v424_v12 }
  0xc6   : > { %2500 = vmatpush3.msra.mxu0 %v424_v12  ;;  %2659 = vmatpush3.msra.mxu1 %v424_v12 }
  0xc7   : > { %2501 = vmatprep.subr.mxu0 %v423_v13  ;;  %2644 = vmatprep.subr.mxu1 %v423_v13 }
  0xc8   : > { %2502 = vmatpush3.msra.mxu0 %v423_v13  ;;  %2660 = vmatpush3.msra.mxu1 %v423_v13 }
  0xc9   : > { %2503 = vmatprep.subr.mxu0 %v422_v14  ;;  %2645 = vmatprep.subr.mxu1 %v422_v14 }
  0xca   : > { %2504 = vmatpush3.msra.mxu0 %v422_v14  ;;  %2661 = vmatpush3.msra.mxu1 %v422_v14 }
  0xcb   : > { %2505 = vmatprep.subr.mxu0 %v421_v15  ;;  %2646 = vmatprep.subr.mxu1 %v421_v15 }
  0xcc   : > { %2506 = vmatpush3.msra.mxu0 %v421_v15  ;;  %2662 = vmatpush3.msra.mxu1 %v421_v15 }
  0xcd   : > { %2507 = vmatprep.mubr.f32.mxu0 %v417_v16  ;;  %2510 = vmatprep.mubr.f32.mxu1 %v419_v17 }
  0xce   : > { %2508 = vmatmul.mubr.f32.vlgmr.msra.gmra.mxu0 %v418_v18  ;;  %2511 = vmatmul.mubr.f32.vlgmr.msra.gmra.mxu1 %v420_v19 }
 0x18e   : > { %v2509_v22 = vpop.f32.mrf.mxu0  ;;  %v2512_v23 = vpop.f32.mrf.mxu1 }
 0x18f   : > { %523 = vst [vmem:[#allocation2] sm:$0xff] %v2509_v22  ;;  %525 = vst [vmem:[#allocation2 + $0x8] sm:$0xff] %v2512_v23 }
 0x190   : > { %v503_v24 = vpop.f32.mrf.mxu0  ;;  %v513_v25 = vpop.f32.mrf.mxu1 }
 0x191   : > { %522 = vst [vmem:[#allocation2 + $0x10] sm:$0xff] %v503_v24  ;;  %524 = vst [vmem:[#allocation2 + $0x18] sm:$0xff] %v513_v25 }
 0x192 PF: > { %v3599_v26 = vld [vmem:[%s353_s17 + $0x8] sm:$0xff]  ;;  %vm547_vm1 = vcmask 261120   ;;  %v539_v27 = vld [vmem:[%s353_s17] sm:$0xff]  ;;  %vm655_vm2 = vcmask 130048   ;;  %v3247_v40 = vmov 0   ;;  %s3248_s22 = smov 96  }
 0x193   : > { %2513 = vmatprep.subr.msk.mxu0 %vm547_vm1, %v3599_v26  ;;  %2861 = vset.pattern.permute.xlu0 %v3247_v40  ;;  %v3631_v41 = vld [vmem:[#allocation4] sm:$0xff]  ;;  %v3636_v44 = vld [vmem:[#allocation4 + $0x8] sm:$0xff]  ;;  %v3642_v48 = vld [vmem:[#allocation4 + $0x10] sm:$0xff]  ;;  %s3249_s12 = smov 64   ;;  %s3250_s11 = smov 32   ;;  %vm1885_vm3 = vcmask 7168  }
 0x194   : > { %2514 = vmatpush3.xpose.msk.msra.mxu0 %vm547_vm1, %v3599_v26  ;;  %2862 = vset.pattern.permute.xlu1 %v3247_v40  ;;  %v3649_v50 = vld [vmem:[#allocation4 + $0x18] sm:$0xff]  ;;  %v3664_v54 = vld [vmem:[%s362_s6] sm:$0xff]  ;;  %vm1890_vm4 = vcmask 15360   ;;  %vm1895_vm5 = vcmask 23552   ;;  %vm1900_vm6 = vcmask 31744   ;;  %vm1799_vm7 = vcmask 523264  }
 0x195   : > { %2515 = vmatprep.subr.msk.mxu0 %vm547_vm1, %v539_v27  ;;  %v3658_v53 = vld [vmem:[%s362_s6 + $0x8] sm:$0xff]  ;;  %vm1804_vm8 = vcmask 785408   ;;  %s4329_s21 = sld [smem:[#allocation23_spill]] }
 0x196   : > { %v544_v29 = vld [vmem:[#allocation2] sm:$0xff]  ;;  %v546_v31 = vld [vmem:[#allocation2 + $0x8] sm:$0xff]  ;;  %2523 = vmatprep.subr.mxu1 %v3658_v53 }
 0x197   : > { %2524 = vmatpush3.msra.mxu1 %v3658_v53 }
 0x198   : > { %v3603_v28 = vld [vmem:[#allocation2 + $0x10] sm:$0xff]  ;;  %2516 = vmatpush3.xpose.msk.msra.mxu0 %vm547_vm1, %v539_v27  ;;  %v545_v30 = vld [vmem:[#allocation2 + $0x18] sm:$0xff]  ;;  %2525 = vmatprep.subr.mxu1 %v3664_v54 }
 0x199   : > { %2517 = vmatprep.mubr.msk.f32.mxu0 %vm547_vm1, %v3603_v28  ;;  %2526 = vmatpush3.msra.mxu1 %v3664_v54 }
 0x19b   : > { %2518 = vmatmul.mubr.msk.f32.vlgmr.msra.gmra.mxu0 %vm547_vm1, %v544_v29  ;;  %p2379_p3 = scmp.ne.s32.totalorder %s4329_s21, 1 }
 0x19c   : > { %2520 = vmatprep.mubr.msk.f32.mxu0 %vm547_vm1, %v545_v30  ;;  %s4330_s16 = sld [smem:[#allocation39_spill]] (!%p2379_p3) }
 0x19f   : > { %2521 = vmatmul.mubr.msk.f32.gmra.mxu0 %vm547_vm1, %v546_v31 }
 0x25b   : > { %v3616_v32 = vpop.f32.mrf.mxu0 }
 0x25c   : > { %v659_v37 = vsel %vm655_vm2, %v3616_v32, -inf }
 0x25d   : > { %v632_v33 = vpop.f32.mrf.mxu0 }
 0x25e   : > { %v656_v34 = vsel %vm655_vm2, %v632_v33, -inf }
 0x25f   : > { %657 = vmax.xlane.f32.xlu0 %v656_v34  ;;  %v3619_v35 = vpop.f32.mrf.mxu0 }
 0x260   : > { %v665_v39 = vsel %vm655_vm2, %v3619_v35, -inf }
 0x261   : > { %v3621_v36 = vpop.f32.mrf.mxu0 }
 0x262   : > { %v662_v38 = vsel %vm655_vm2, %v3621_v36, -inf }
 0x263   : > { %660 = vmax.xlane.f32.xlu0 %v659_v37  ;;  %663 = vmax.xlane.f32.xlu1 %v662_v38 }
 0x267   : > { %666 = vmax.xlane.f32.xlu1 %v665_v39 }
 0x2e8   : > { %v658_v42 = vpop.xlane.xlu0 %657 }
 0x2e9   : > { %v3634_v43 = vmax.f32 %v3631_v41, %v658_v42 }
 0x2eb   : > { %686 = vperm.xlu0 %2861, %v3634_v43  }
 0x2ec   : > { %v661_v45 = vpop.xlane.xlu0 %660  ;;  %v664_v46 = vpop.xlane.xlu1 %663 }
 0x2ed   : > { %v3640_v47 = vmax.f32 %v3636_v44, %v661_v45  ;;  %v3647_v49 = vmax.f32 %v3642_v48, %v664_v46  ;;  %v3251_v46 = vmov 1  }
 0x2ef   : > { %691 = vperm.xlu1 %2862, %v3640_v47   ;;  %861 = vrot.lane.b32.xlu0 %v545_v30, %s3248_s22 }
 0x2f0   : > { %v667_v51 = vpop.xlane.xlu1 %666  ;;  %2863 = vset.pattern.permute.xlu0 %v3251_v46 }
 0x2f1   : > { %v3654_v52 = vmax.f32 %v3649_v50, %v667_v51 }
 0x2f3   : > { %696 = vperm.xlu1 %2862, %v3647_v49   ;;  %1179 = vrot.lane.b32.xlu0 %v539_v27, %s3249_s12 }
 0x2f7   : > { %701 = vperm.xlu1 %2862, %v3654_v52   ;;  %1173 = vrot.lane.b32.xlu0 %v544_v29, %s3249_s12 }
 0x2fb   : > { %867 = vrot.lane.b32.xlu1 %v3599_v26, %s3248_s22  ;;  %1175 = vrot.lane.b32.xlu0 %v545_v30, %s3249_s12 }
 0x2fc   : > { %2864 = vset.pattern.permute.xlu1 %v3251_v46 }
 0x2ff   : > { %865 = vrot.lane.b32.xlu1 %v539_v27, %s3248_s22  ;;  %1491 = vrot.lane.b32.xlu0 %v539_v27, %s3250_s11 }
 0x303   : > { %857 = vrot.lane.b32.xlu1 %v3603_v28, %s3248_s22  ;;  %1485 = vrot.lane.b32.xlu0 %v544_v29, %s3250_s11 }
 0x307   : > { %859 = vrot.lane.b32.xlu1 %v544_v29, %s3248_s22  ;;  %1489 = vrot.lane.b32.xlu0 %v546_v31, %s3250_s11 }
 0x30b   : > { %1181 = vrot.lane.b32.xlu1 %v3599_v26, %s3249_s12 }
 0x30f   : > { %863 = vrot.lane.b32.xlu1 %v546_v31, %s3248_s22 }
 0x313   : > { %1171 = vrot.lane.b32.xlu1 %v3603_v28, %s3249_s12 }
 0x317   : > { %1493 = vrot.lane.b32.xlu1 %v3599_v26, %s3250_s11 }
 0x31b   : > { %1177 = vrot.lane.b32.xlu1 %v546_v31, %s3249_s12 }
 0x31f   : > { %1483 = vrot.lane.b32.xlu1 %v3603_v28, %s3250_s11 }
 0x323   : > { %1487 = vrot.lane.b32.xlu1 %v545_v30, %s3250_s11 }
 0x366   : > { %v687_v55 = vpop.permute.xlu0 %686 }
 0x367   : > { %v704_v56 = vsub.f32 %v632_v33, %v687_v55 }
 0x369   : > { %v708_v57 = vmul.f32 1.442695, %v704_v56 }
 0x36a   : > { %v692_v58 = vpop.permute.xlu1 %691  ;;  %v862_v5 = vpop.permute.xlu0 %861 }
 0x36b   : > { %2875 = vpow2.f32 %v708_v57  ;;  %v705_v59 = vsub.f32 %v3616_v32, %v692_v58 }
 0x36d   : > { %v710_v60 = vmul.f32 1.442695, %v705_v59 }
 0x36e   : > { %v697_v61 = vpop.permute.xlu1 %696  ;;  %v1180_v9 = vpop.permute.xlu0 %1179 }
 0x36f   : > { %2877 = vpow2.f32 %v710_v60  ;;  %v706_v62 = vsub.f32 %v3621_v36, %v697_v61 }
 0x371   : > { %v712_v63 = vmul.f32 1.442695, %v706_v62 }
 0x372   : > { %v702_v0 = vpop.permute.xlu1 %701  ;;  %v1174_v13 = vpop.permute.xlu0 %1173 }
 0x373   : > { %2879 = vpow2.f32 %v712_v63  ;;  %v707_v1 = vsub.f32 %v3619_v35, %v702_v0 }
 0x375   : > { %v714_v2 = vmul.f32 1.442695, %v707_v1 }
 0x376   : > { %v868_v3 = vpop.permute.xlu1 %867  ;;  %v1176_v16 = vpop.permute.xlu0 %1175 }
 0x377   : > { %2881 = vpow2.f32 %v714_v2  ;;  %2533 = vmatprep.subr.msk.mxu1 %vm547_vm1, %v868_v3 }
 0x378   : > { %v3695_v4 = vpop.eup %2875 }
 0x379   : > { %2527 = vmatprep.mubr.msk.f32.mxu1 %vm655_vm2, %v3695_v4  ;;  %v724_v2 = vsel %vm655_vm2, %v3695_v4, 0.0 }
 0x37a   : > { %v866_v6 = vpop.permute.xlu1 %865  ;;  %v1492_v18 = vpop.permute.xlu0 %1491 }
 0x37c   : > { %v3699_v7 = vpop.eup %2877 }
 0x37d   : > { %2528 = vmatmul.mubr.msk.f32.vlgmr.msra.gmra.mxu1 %vm655_vm2, %v3699_v7  ;;  %v727_v1 = vsel %vm655_vm2, %v3699_v7, 0.0 }
 0x37e   : > { %2534 = vmatpush3.xpose.msk.msra.mxu1 %vm547_vm1, %v868_v3  ;;  %v858_v8 = vpop.permute.xlu1 %857  ;;  %v1486_v21 = vpop.permute.xlu0 %1485 }
 0x37f   : > { %2535 = vmatprep.subr.msk.mxu1 %vm547_vm1, %v866_v6 }
 0x380   : > { %v3705_v10 = vpop.eup %2879 }
 0x381   : > { %2530 = vmatprep.mubr.msk.f32.mxu1 %vm655_vm2, %v3705_v10  ;;  %v730_v3 = vsel %vm655_vm2, %v3705_v10, 0.0  ;;  %v3252_v10 = vmov 3  }
 0x382   : > { %2536 = vmatpush3.xpose.msk.msra.mxu1 %vm547_vm1, %v866_v6  ;;  %v860_v11 = vpop.permute.xlu1 %859  ;;  %v1490_v23 = vpop.permute.xlu0 %1489 }
 0x384   : > { %v3710_v12 = vpop.eup %2881 }
 0x385   : > { %2531 = vmatmul.mubr.msk.f32.gmra.mxu1 %vm655_vm2, %v3710_v12 }
 0x386   : > { %2537 = vmatprep.mubr.msk.f32.mxu1 %vm547_vm1, %v858_v8  ;;  %v1182_v14 = vpop.permute.xlu1 %1181 }
 0x387   : > { %2553 = vmatprep.subr.msk.mxu1 %vm547_vm1, %v1182_v14 }
 0x389   : > { %2538 = vmatmul.mubr.msk.f32.vlgmr.msra.gmra.mxu1 %vm547_vm1, %v860_v11 }
 0x38a   : > { %2554 = vmatpush3.xpose.msk.msra.mxu1 %vm547_vm1, %v1182_v14  ;;  %v864_v15 = vpop.permute.xlu1 %863  ;;  %2540 = vmatprep.mubr.msk.f32.mxu1 %vm547_vm1, %v862_v5 }
 0x38b   : > { %2555 = vmatprep.subr.msk.mxu1 %vm547_vm1, %v1180_v9 }
 0x38d   : > { %2541 = vmatmul.mubr.msk.f32.gmra.mxu1 %vm547_vm1, %v864_v15 }
 0x38e   : > { %2556 = vmatpush3.xpose.msk.msra.mxu1 %vm547_vm1, %v1180_v9  ;;  %v1172_v17 = vpop.permute.xlu1 %1171 }
 0x38f   : > { %2557 = vmatprep.mubr.msk.f32.mxu1 %vm547_vm1, %v1172_v17  ;;  %v672_v17 = vsub.f32 %v3631_v41, %v3634_v43 }
 0x391   : > { %2558 = vmatmul.mubr.msk.f32.vlgmr.msra.gmra.mxu1 %vm547_vm1, %v1174_v13 }
 0x392   : > { %v1494_v19 = vpop.permute.xlu1 %1493  ;;  %2560 = vmatprep.mubr.msk.f32.mxu1 %vm547_vm1, %v1176_v16 }
 0x393   : > { %2573 = vmatprep.subr.msk.mxu1 %vm547_vm1, %v1494_v19 }
 0x394   : > { %2574 = vmatpush3.xpose.msk.msra.mxu1 %vm547_vm1, %v1494_v19 }
 0x395   : > { %2575 = vmatprep.subr.msk.mxu1 %vm547_vm1, %v1492_v18 }
 0x396   : > { %v1178_v20 = vpop.permute.xlu1 %1177 }
 0x397   : > { %2561 = vmatmul.mubr.msk.f32.gmra.mxu1 %vm547_vm1, %v1178_v20  ;;  %v3253_v20 = vmov 2  }
 0x398   : > { %2576 = vmatpush3.xpose.msk.msra.mxu1 %vm547_vm1, %v1492_v18 }
 0x39a   : > { %v1484_v22 = vpop.permute.xlu1 %1483 }
 0x39b   : > { %2577 = vmatprep.mubr.msk.f32.mxu1 %vm547_vm1, %v1484_v22  ;;  %v673_v22 = vsub.f32 %v3636_v44, %v3640_v47 }
 0x39c   : > { %2578 = vmatmul.mubr.msk.f32.vlgmr.msra.gmra.mxu1 %vm547_vm1, %v1486_v21  ;;  %v676_v21 = vmul.f32 1.442695, %v672_v17 }
 0x39e   : > { %v1488_v24 = vpop.permute.xlu1 %1487  ;;  %2883 = vpow2.f32 %v676_v21 }
 0x39f   : > { %2580 = vmatprep.mubr.msk.f32.mxu1 %vm547_vm1, %v1488_v24 }
 0x3a0   : > { %2581 = vmatmul.mubr.msk.f32.gmra.mxu1 %vm547_vm1, %v1490_v23 }
 0x43d   : > { %v3734_v25 = vpop.f32.mrf.mxu1 }
 0x43f   : > { %v3736_v26 = vpop.f32.mrf.mxu1 }
 0x445   : > { %v3738_v27 = vpop.f32.mrf.mxu1 }
 0x447   : > { %v3740_v28 = vpop.f32.mrf.mxu1 }
 0x449   : > { %v3742_v29 = vpop.f32.mrf.mxu1 }
 0x44a   : > { %v969_v30 = vsel %vm655_vm2, %v3742_v29, -inf }
 0x44b   : > { %970 = vmax.xlane.f32.xlu0 %v969_v30  ;;  %v3746_v31 = vpop.f32.mrf.mxu1 }
 0x44c   : > { %v966_v32 = vsel %vm655_vm2, %v3746_v31, -inf }
 0x44d   : > { %967 = vmax.xlane.f32.xlu1 %v966_v32  ;;  %v3750_v33 = vpop.f32.mrf.mxu1 }
 0x44e   : > { %v975_v34 = vsel %vm655_vm2, %v3750_v33, -inf }
 0x44f   : > { %v3754_v35 = vpop.f32.mrf.mxu1 }
 0x450   : > { %v972_v36 = vsel %vm655_vm2, %v3754_v35, -inf }
 0x451   : > { %976 = vmax.xlane.f32.xlu1 %v975_v34  ;;  %973 = vmax.xlane.f32.xlu0 %v972_v36  ;;  %v3758_v37 = vpop.f32.mrf.mxu1 }
 0x452   : > { %v1283_v38 = vsel %vm655_vm2, %v3758_v37, -inf }
 0x453   : > { %v3762_v39 = vpop.f32.mrf.mxu1 }
 0x454   : > { %v1280_v42 = vsel %vm655_vm2, %v3762_v39, -inf }
 0x455   : > { %1284 = vmax.xlane.f32.xlu1 %v1283_v38  ;;  %1281 = vmax.xlane.f32.xlu0 %v1280_v42 }
 0x457   : > { %v3766_v45 = vpop.f32.mrf.mxu1 }
 0x458   : > { %v1289_v51 = vsel %vm655_vm2, %v3766_v45, -inf }
 0x459   : > { %1290 = vmax.xlane.f32.xlu1 %v1289_v51  ;;  %v3772_v55 = vpop.f32.mrf.mxu1 }
 0x45a   : > { %v1286_v56 = vsel %vm655_vm2, %v3772_v55, -inf }
 0x45b   : > { %1287 = vmax.xlane.f32.xlu0 %v1286_v56 }
 0x45c   : > { %v3776_v57 = vpop.f32.mrf.mxu1 }
 0x45d   : > { %v1595_v58 = vsel %vm655_vm2, %v3776_v57, -inf }
 0x45e   : > { %1596 = vmax.xlane.f32.xlu1 %v1595_v58  ;;  %v3780_v59 = vpop.f32.mrf.mxu1  ;;  %v674_v58 = vsub.f32 %v3642_v48, %v3647_v49 }
 0x45f   : > { %v1592_v60 = vsel %vm655_vm2, %v3780_v59, -inf }
 0x460   : > { %1593 = vmax.xlane.f32.xlu0 %v1592_v60  ;;  %v3784_v61 = vpop.f32.mrf.mxu1 }
 0x461   : > { %v1601_v62 = vsel %vm655_vm2, %v3784_v61, -inf }
 0x462   : > { %1602 = vmax.xlane.f32.xlu1 %v1601_v62  ;;  %v3788_v63 = vpop.f32.mrf.mxu1 }
 0x463   : > { %v1598_v0 = vsel %vm655_vm2, %v3788_v63, -inf }
 0x464   : > { %1599 = vmax.xlane.f32.xlu0 %v1598_v0 }
 0x466   : > { %728 = vadd.xlane.f32.xlu1 %v727_v1 }
 0x468   : > { %725 = vadd.xlane.f32.xlu0 %v724_v2 }
 0x46c   : > { %731 = vadd.xlane.f32.xlu0 %v730_v3 }
 0x4d4   : > { %v971_v5 = vpop.xlane.xlu0 %970 }
 0x4d5   : > { %v3799_v6 = vmax.f32 %v3636_v44, %v971_v5 }
 0x4d6   : > { %v968_v8 = vpop.xlane.xlu1 %967 }
 0x4d7   : > { %v3802_v9 = vmax.f32 %v3631_v41, %v968_v8  ;;  %1001 = vperm.xlu0 %2863, %v3799_v6   ;;  %v1887_v30 = vsel %vm1885_vm3, %v3640_v47, %v3799_v6  ;;  %v678_v47 = vmul.f32 1.442695, %v673_v22 }
 0x4d9   : > { %996 = vperm.xlu1 %2864, %v3802_v9   ;;  %v1886_v42 = vsel %vm1885_vm3, %v3634_v43, %v3802_v9  ;;  %2885 = vpow2.f32 %v678_v47 }
 0x4da   : > { %v974_v7 = vpop.xlane.xlu0 %973  ;;  %v977_v11 = vpop.xlane.xlu1 %976 }
 0x4db   : > { %v3807_v4 = vmax.f32 %v3649_v50, %v977_v11  ;;  %1050 = vrot.lane.b32.xlu0 %v3658_v53, %s3248_s22  ;;  %v3814_v14 = vmax.f32 %v3642_v48, %v974_v7 }
 0x4dc   : > { %2867 = vset.pattern.permute.xlu0 %v3252_v10 }
 0x4dd   : > { %1011 = vperm.xlu1 %2864, %v3807_v4   ;;  %v1889_v43 = vsel %vm1885_vm3, %v3654_v52, %v3807_v4  ;;  %v1888_v7 = vsel %vm1885_vm3, %v3647_v49, %v3814_v14 }
 0x4de   : > { %v1285_v13 = vpop.xlane.xlu1 %1284  ;;  %v1282_v15 = vpop.xlane.xlu0 %1281 }
 0x4df   : > { %v3820_v18 = vmax.f32 %v3636_v44, %v1285_v13  ;;  %v3827_v23 = vmax.f32 %v3631_v41, %v1282_v15  ;;  %v680_v13 = vmul.f32 1.442695, %v674_v58  ;;  %v675_v15 = vsub.f32 %v3649_v50, %v3654_v52 }
 0x4e0   : > { %v983_v52 = vsub.f32 %v3636_v44, %v3799_v6 }
 0x4e1   : > { %1006 = vperm.xlu1 %2864, %v3814_v14   ;;  %v1892_v34 = vsel %vm1890_vm4, %v1887_v30, %v3820_v18  ;;  %v1891_v60 = vsel %vm1890_vm4, %v1886_v42, %v3827_v23  ;;  %2887 = vpow2.f32 %v680_v13  ;;  %v682_v49 = vmul.f32 1.442695, %v675_v15 }
 0x4e2   : > { %v1291_v16 = vpop.xlane.xlu1 %1290  ;;  %v988_v21 = vmul.f32 1.442695, %v983_v52  ;;  %v1297_v22 = vsub.f32 %v3636_v44, %v3820_v18  ;;  %v733_v42 = vsel %vm655_vm2, %v3710_v12, 0.0 }
 0x4e3   : > { %v3836_v36 = vmax.f32 %v3649_v50, %v1291_v16  ;;  %2889 = vpow2.f32 %v682_v49 }
 0x4e4   : > { %v1288_v19 = vpop.xlane.xlu0 %1287  ;;  %2891 = vpow2.f32 %v988_v21  ;;  %v1302_v6 = vmul.f32 1.442695, %v1297_v22 }
 0x4e5   : > { %2865 = vset.pattern.permute.xlu1 %v3253_v20  ;;  %v3855_v0 = vmax.f32 %v3642_v48, %v1288_v19  ;;  %v1894_v3 = vsel %vm1890_vm4, %v1889_v43, %v3836_v36  ;;  %v3892_v19 = vpop.eup %2883 }
 0x4e6   : > { %1315 = vperm.xlu1 %2865, %v3820_v18   ;;  %2893 = vpow2.f32 %v1302_v6 }
 0x4e7   : > { %v1597_v24 = vpop.xlane.xlu1 %1596  ;;  %v1893_v16 = vsel %vm1890_vm4, %v1888_v7, %v3855_v0  ;;  %v1298_v43 = vsub.f32 %v3642_v48, %v3855_v0 }
 0x4e8   : > { %v1605_v32 = vmax.f32 %v3636_v44, %v1597_v24 }
 0x4e9   : > { %v1594_v38 = vpop.xlane.xlu0 %1593 }
 0x4ea   : > { %v1897_v51 = vsel %vm1895_vm5, %v1892_v34, %v1605_v32  ;;  %v3843_v56 = vmax.f32 %v3631_v41, %v1594_v38  ;;  %1310 = vperm.xlu1 %2865, %v3827_v23   ;;  %v1609_v24 = vsub.f32 %v3636_v44, %v1605_v32 }
 0x4eb   : > { %1902 = vst.msk [vmem:[#allocation4 + $0x8] sm:$0xff] %vm1900_vm6, %v1897_v51  ;;  %v1603_v62 = vpop.xlane.xlu1 %1602  ;;  %v984_v51 = vsub.f32 %v3642_v48, %v3814_v14 }
 0x4ec   : > { %v1896_v1 = vsel %vm1895_vm5, %v1891_v60, %v3843_v56  ;;  %v3860_v2 = vmax.f32 %v3649_v50, %v1603_v62  ;;  %v1614_v18 = vmul.f32 1.442695, %v1609_v24  ;;  %v1296_v60 = vsub.f32 %v3631_v41, %v3827_v23 }
 0x4ed   : > { %1901 = vst.msk [vmem:[#allocation4] sm:$0xff] %vm1900_vm6, %v1896_v1  ;;  %v1600_v5 = vpop.xlane.xlu0 %1599  ;;  %v990_v58 = vmul.f32 1.442695, %v984_v51  ;;  %v1299_v62 = vsub.f32 %v3649_v50, %v3836_v36  ;;  %v1304_v1 = vmul.f32 1.442695, %v1298_v43  ;;  %v1608_v23 = vsub.f32 %v3631_v41, %v3843_v56 }
 0x4ee   : > { %v1899_v8 = vsel %vm1895_vm5, %v1894_v3, %v3860_v2  ;;  %1325 = vperm.xlu1 %2865, %v3836_v36   ;;  %1637 = vperm.xlu0 %2867, %v3860_v2   ;;  %v3874_v11 = vmax.f32 %v3642_v48, %v1600_v5  ;;  %2895 = vpow2.f32 %v1614_v18  ;;  %v1611_v5 = vsub.f32 %v3649_v50, %v3860_v2 }
 0x4ef   : > { %1904 = vst.msk [vmem:[#allocation4 + $0x18] sm:$0xff] %vm1900_vm6, %v1899_v8  ;;  %v1306_v12 = vmul.f32 1.442695, %v1299_v62  ;;  %v1612_v36 = vmul.f32 1.442695, %v1608_v23  ;;  %v3967_v2 = vpop.xlane.xlu1 %728 }
 0x4f0   : > { %v1898_v17 = vsel %vm1895_vm5, %v1893_v16, %v3874_v11  ;;  %v1618_v7 = vmul.f32 1.442695, %v1611_v5 }
 0x4f1   : > { %1903 = vst.msk [vmem:[#allocation4 + $0x10] sm:$0xff] %vm1900_vm6, %v1898_v17  ;;  %v3954_v8 = vpop.xlane.xlu0 %725 }
 0x4f2   : > { %1320 = vperm.xlu1 %2865, %v3855_v0   ;;  %1360 = vrot.lane.b32.xlu0 %v3664_v54, %s3249_s12 }
 0x4f3   : > { %2868 = vset.pattern.permute.xlu0 %v3247_v40  ;;  %v3898_v40 = vpop.eup %2885 }
 0x4f4   : > { %v3903_v30 = vpop.eup %2887 }
 0x4f5   : > { %v3909_v34 = vpop.eup %2889 }
 0x4f6   : > { %2866 = vset.pattern.permute.xlu1 %v3252_v10  ;;  %1672 = vrot.lane.b32.xlu0 %v3664_v54, %s3250_s11  ;;  %v3914_v44 = vpop.eup %2891 }
 0x4f7   : > { %1627 = vperm.xlu1 %2866, %v1605_v32  }
 0x4fa   : > { %839 = vperm.xlu0 %2868, %v3892_v19  }
 0x4fb   : > { %1622 = vperm.xlu1 %2866, %v3843_v56   ;;  %v3963_v56 = vpop.xlane.xlu0 %731 }
 0x4fe   : > { %844 = vperm.xlu0 %2868, %v3898_v40  }
 0x4ff   : > { %1632 = vperm.xlu1 %2866, %v3874_v11  }
 0x502   : > { %849 = vperm.xlu0 %2868, %v3903_v30  }
 0x503   : > { %1048 = vrot.lane.b32.xlu1 %v3664_v54, %s3248_s22  ;;  %v3920_v54 = vpop.eup %2893 }
 0x504   : > { %2869 = vset.pattern.permute.xlu1 %v3251_v46  ;;  %v3924_v32 = vpop.eup %2895 }
 0x506   : > { %854 = vperm.xlu0 %2868, %v3909_v34  }
 0x507   : > { %1362 = vrot.lane.b32.xlu1 %v3658_v53, %s3249_s12 }
 0x50a   : > { %2870 = vset.pattern.permute.xlu0 %v3251_v46  ;;  %v982_v46 = vsub.f32 %v3631_v41, %v3802_v9  ;;  %v1300_v9 = vmul.f32 1.442695, %v1296_v60  ;;  %v1610_v41 = vsub.f32 %v3642_v48, %v3874_v11 }
 0x50b   : > { %1674 = vrot.lane.b32.xlu1 %v3658_v53, %s3250_s11  ;;  %1158 = vperm.xlu0 %2870, %v3914_v44   ;;  %v985_v53 = vsub.f32 %v3649_v50, %v3807_v4 }
 0x50c   : > { %v986_v38 = vmul.f32 1.442695, %v982_v46  ;;  %v1616_v50 = vmul.f32 1.442695, %v1610_v41 }
 0x50d   : > { %v992_v47 = vmul.f32 1.442695, %v985_v53 }
 0x50e   : > { %2897 = vpow2.f32 %v986_v38 }
 0x50f   : > { %2871 = vset.pattern.permute.xlu0 %v3253_v20  ;;  %2899 = vpow2.f32 %v992_v47 }
 0x510   : > { %1470 = vperm.xlu0 %2871, %v3920_v54   ;;  %2901 = vpow2.f32 %v990_v58 }
 0x511   : > { %2903 = vpow2.f32 %v1300_v9 }
 0x512   : > { %2905 = vpow2.f32 %v1306_v12 }
 0x513   : > { %2907 = vpow2.f32 %v1304_v1 }
 0x514   : > { %2873 = vset.pattern.permute.xlu0 %v3252_v10  ;;  %2909 = vpow2.f32 %v1612_v36 }
 0x515   : > { %1782 = vperm.xlu0 %2873, %v3924_v32   ;;  %2911 = vpow2.f32 %v1618_v7 }
 0x516   : > { %2913 = vpow2.f32 %v1616_v50 }
 0x51b   : > { %v3940_v4 = vpop.eup %2897 }
 0x51c   : > { %v3945_v14 = vpop.eup %2899 }
 0x51d   : > { %v3950_v3 = vpop.eup %2901 }
 0x51e   : > { %v3957_v0 = vpop.eup %2903 }
 0x51f   : > { %v3965_v13 = vpop.eup %2905 }
 0x520   : > { %v3970_v16 = vpop.eup %2907 }
 0x521   : > { %v3974_v52 = vpop.eup %2909 }
 0x522   : > { %v3978_v22 = vpop.eup %2911 }
 0x52f   : > { %734 = vadd.xlane.f32.xlu1 %v733_v42 }
 0x540   : > { %1153 = vperm.xlu1 %2869, %v3940_v4  }
 0x544   : > { %1168 = vperm.xlu1 %2869, %v3945_v14  }
 0x548   : > { %1163 = vperm.xlu1 %2869, %v3950_v3  }
 0x54c   : > { %2872 = vset.pattern.permute.xlu1 %v3253_v20 }
 0x54d   : > { %1465 = vperm.xlu1 %2872, %v3957_v0  }
 0x551   : > { %1480 = vperm.xlu1 %2872, %v3965_v13  }
 0x552   : > { %v1002_v15 = vpop.permute.xlu0 %1001 }
 0x553   : > { %v1015_v51 = vsub.f32 %v3742_v29, %v1002_v15 }
 0x554   : > { %v997_v17 = vpop.permute.xlu1 %996 }
 0x555   : > { %v1014_v48 = vsub.f32 %v3746_v31, %v997_v17  ;;  %1475 = vperm.xlu1 %2872, %v3970_v16   ;;  %v3981_v31 = vpop.eup %2913  ;;  %v1020_v9 = vmul.f32 1.442695, %v1015_v51 }
 0x556   : > { %v1051_v20 = vpop.permute.xlu0 %1050 }
 0x557   : > { %v1018_v11 = vmul.f32 1.442695, %v1014_v48  ;;  %2543 = vmatprep.subr.mxu0 %v1051_v20 }
 0x558   : > { %v1012_v49 = vpop.permute.xlu1 %1011  ;;  %2544 = vmatpush3.msra.mxu0 %v1051_v20 }
 0x559   : > { %2915 = vpow2.f32 %v1018_v11  ;;  %2874 = vset.pattern.permute.xlu1 %v3252_v10  ;;  %v1017_v60 = vsub.f32 %v3750_v33, %v1012_v49 }
 0x55a   : > { %1777 = vperm.xlu1 %2874, %v3974_v52  }
 0x55b   : > { %v1024_v1 = vmul.f32 1.442695, %v1017_v60 }
 0x55c   : > { %v1007_v21 = vpop.permute.xlu1 %1006 }
 0x55d   : > { %v1016_v47 = vsub.f32 %v3754_v35, %v1007_v21 }
 0x55e   : > { %1792 = vperm.xlu1 %2874, %v3978_v22  }
 0x55f   : > { %v1022_v62 = vmul.f32 1.442695, %v1016_v47 }
 0x561   : > { %v1316_v6 = vpop.permute.xlu1 %1315 }
 0x562   : > { %v1329_v24 = vsub.f32 %v3758_v37, %v1316_v6  ;;  %1787 = vperm.xlu1 %2874, %v3981_v31  }
 0x564   : > { %v1334_v18 = vmul.f32 1.442695, %v1329_v24 }
 0x565   : > { %v1311_v46 = vpop.permute.xlu1 %1310 }
 0x566   : > { %v2916_v38 = vpop.eup %2915  ;;  %2917 = vpow2.f32 %v1334_v18  ;;  %v1328_v12 = vsub.f32 %v3762_v39, %v1311_v46 }
 0x567   : > { %2547 = vmatprep.mubr.msk.f32.mxu0 %vm655_vm2, %v2916_v38  ;;  %v1030_v10 = vsel %vm655_vm2, %v2916_v38, 0.0  ;;  %2919 = vpow2.f32 %v1020_v9 }
 0x568   : > { %1031 = vadd.xlane.f32.xlu0 %v1030_v10  ;;  %2921 = vpow2.f32 %v1022_v62  ;;  %v1332_v7 = vmul.f32 1.442695, %v1328_v12 }
 0x569   : > { %v1638_v53 = vpop.permute.xlu0 %1637  ;;  %v1326_v42 = vpop.permute.xlu1 %1325  ;;  %2923 = vpow2.f32 %v1024_v1 }
 0x56a   : > { %v1331_v50 = vsub.f32 %v3766_v45, %v1326_v42  ;;  %v1643_v6 = vsub.f32 %v3784_v61, %v1638_v53 }
 0x56c   : > { %v1338_v20 = vmul.f32 1.442695, %v1331_v50 }
 0x56d   : > { %v3989_v58 = vpop.permute.xlu0 %1360  ;;  %v1321_v37 = vpop.permute.xlu1 %1320 }
 0x56e   : > { %v1330_v29 = vsub.f32 %v3772_v55, %v1321_v37 }
 0x570   : > { %v1336_v15 = vmul.f32 1.442695, %v1330_v29 }
 0x571   : > { %v3993_v43 = vpop.permute.xlu0 %1672 }
 0x572   : > { %v1628_v23 = vpop.permute.xlu1 %1627 }
 0x573   : > { %v2918_v36 = vpop.eup %2917  ;;  %v1641_v5 = vsub.f32 %v3776_v57, %v1628_v23 }
 0x574   : > { %v1347_v35 = vsel %vm655_vm2, %v2918_v36, 0.0  ;;  %v2920_v45 = vpop.eup %2919 }
 0x575   : > { %v1646_v41 = vmul.f32 1.442695, %v1641_v5  ;;  %v3998_v33 = vpop.permute.xlu0 %839  ;;  %1348 = vadd.xlane.f32.xlu0 %v1347_v35  ;;  %v1033_v61 = vsel %vm655_vm2, %v2920_v45, 0.0 }
 0x576   : > { %v1623_v39 = vpop.permute.xlu1 %1622 }
 0x577   : > { %2925 = vpow2.f32 %v1646_v41  ;;  %v1640_v17 = vsub.f32 %v3780_v59, %v1623_v39  ;;  %v2922_v59 = vpop.eup %2921 }
 0x578   : > { %2927 = vpow2.f32 %v1332_v7  ;;  %v2924_v38 = vpop.eup %2923 }
 0x579   : > { %v845_v57 = vpop.permute.xlu0 %844  ;;  %2929 = vpow2.f32 %v1336_v15  ;;  %v1644_v55 = vmul.f32 1.442695, %v1640_v17  ;;  %v1039_v9 = vsel %vm655_vm2, %v2924_v38, 0.0 }
 0x57a   : > { %v1633_v48 = vpop.permute.xlu1 %1632  ;;  %2931 = vpow2.f32 %v1338_v20 }
 0x57b   : > { %v1642_v11 = vsub.f32 %v3788_v63, %v1633_v48  ;;  %2933 = vpow2.f32 %v1644_v55  ;;  %v1650_v63 = vmul.f32 1.442695, %v1643_v6 }
 0x57d   : > { %v4003_v49 = vpop.permute.xlu0 %849  ;;  %v1648_v24 = vmul.f32 1.442695, %v1642_v11 }
 0x57e   : > { %v1049_v21 = vpop.permute.xlu1 %1048 }
 0x57f   : > { %2545 = vmatprep.subr.mxu0 %v1049_v21  ;;  %2935 = vpow2.f32 %v1648_v24 }
 0x580   : > { %2546 = vmatpush3.msra.mxu0 %v1049_v21  ;;  %2937 = vpow2.f32 %v1650_v63 }
 0x581   : > { %v855_v18 = vpop.permute.xlu0 %854  ;;  %2548 = vmatmul.mubr.msk.f32.vlgmr.msra.gmra.mxu0 %vm655_vm2, %v2920_v45 }
 0x582   : > { %2550 = vmatprep.mubr.msk.f32.mxu0 %vm655_vm2, %v2922_v59  ;;  %v1363_v46 = vpop.permute.xlu1 %1362 }
 0x583   : > { %2563 = vmatprep.subr.mxu0 %v1363_v46 }
 0x584   : > { %v2926_v10 = vpop.eup %2925  ;;  %2564 = vmatpush3.msra.mxu0 %v1363_v46 }
 0x585   : > { %2551 = vmatmul.mubr.msk.f32.gmra.mxu0 %vm655_vm2, %v2924_v38  ;;  %v1659_v53 = vsel %vm655_vm2, %v2926_v10, 0.0  ;;  %2565 = vmatprep.subr.mxu0 %v3989_v58  ;;  %v2928_v42 = vpop.eup %2927 }
 0x586   : > { %v1159_v51 = vpop.permute.xlu0 %1158  ;;  %1034 = vadd.xlane.f32.xlu1 %v1033_v61  ;;  %1660 = vadd.xlane.f32.xlu0 %v1659_v53  ;;  %v1675_v47 = vpop.permute.xlu1 %1674  ;;  %v1344_v5 = vsel %vm655_vm2, %v2928_v42, 0.0 }
 0x587   : > { %v1796_v37 = vsel %vm547_vm1, %v845_v57, %v1159_v51  ;;  %2567 = vmatprep.mubr.msk.f32.mxu0 %vm655_vm2, %v2928_v42  ;;  %2566 = vmatpush3.msra.mxu0 %v3989_v58  ;;  %v2930_v60 = vpop.eup %2929  ;;  %v1036_v58 = vsel %vm655_vm2, %v2922_v59, 0.0 }
 0x588   : > { %2583 = vmatprep.subr.mxu0 %v1675_v47  ;;  %v2932_v12 = vpop.eup %2931  ;;  %v1350_v7 = vsel %vm655_vm2, %v2930_v60, 0.0 }
 0x589   : > { %2568 = vmatmul.mubr.msk.f32.vlgmr.msra.gmra.mxu0 %vm655_vm2, %v2918_v36  ;;  %v2934_v23 = vpop.eup %2933  ;;  %v1353_v35 = vsel %vm655_vm2, %v2932_v12, 0.0 }
 0x58a   : > { %1040 = vadd.xlane.f32.xlu1 %v1039_v9  ;;  %2570 = vmatprep.mubr.msk.f32.mxu0 %vm655_vm2, %v2930_v60  ;;  %v1656_v41 = vsel %vm655_vm2, %v2934_v23, 0.0 }
 0x58b   : > { %v1471_v62 = vpop.permute.xlu0 %1470  ;;  %2584 = vmatpush3.msra.mxu0 %v1675_v47 }
 0x58c   : > { %v4019_v1 = vsel %vm1799_vm7, %v1796_v37, %v1471_v62  ;;  %2585 = vmatprep.subr.mxu0 %v3993_v43  ;;  %v2936_v36 = vpop.eup %2935 }
 0x58d   : > { %2571 = vmatmul.mubr.msk.f32.gmra.mxu0 %vm655_vm2, %v2932_v12  ;;  %v2938_v29 = vpop.eup %2937  ;;  %v1662_v39 = vsel %vm655_vm2, %v2936_v36, 0.0 }
 0x58e   : > { %1037 = vadd.xlane.f32.xlu1 %v1036_v58  ;;  %2587 = vmatprep.mubr.msk.f32.mxu0 %vm655_vm2, %v2934_v23 }
 0x58f   : > { %2586 = vmatpush3.msra.mxu0 %v3993_v43  ;;  %v1665_v43 = vsel %vm655_vm2, %v2938_v29, 0.0 }
 0x590   : > { %v4052_v61 = vpop.permute.xlu0 %1782 }
 0x591   : > { %2588 = vmatmul.mubr.msk.f32.vlgmr.msra.gmra.mxu0 %vm655_vm2, %v2926_v10 }
 0x592   : > { %1345 = vadd.xlane.f32.xlu1 %v1344_v5  ;;  %2590 = vmatprep.mubr.msk.f32.mxu0 %vm655_vm2, %v2936_v36 }
 0x595   : > { %2591 = vmatmul.mubr.msk.f32.gmra.mxu0 %vm655_vm2, %v2938_v29 }
 0x596   : > { %1354 = vadd.xlane.f32.xlu1 %v1353_v35 }
 0x59a   : > { %1351 = vadd.xlane.f32.xlu1 %v1350_v7 }
 0x59e   : > { %1657 = vadd.xlane.f32.xlu1 %v1656_v41  ;;  %v716_v41 = vld [vmem:[#allocation5] sm:$0xff] }
 0x5a2   : > { %1666 = vadd.xlane.f32.xlu1 %v1665_v43 }
 0x5a6   : > { %1663 = vadd.xlane.f32.xlu1 %v1662_v39  ;;  %v720_v39 = vmul.f32 %v3892_v19, %v716_v41 }
 0x5b8   : > { %v735_v50 = vpop.xlane.xlu1 %734 }
 0x5bc   : > { %v1154_v15 = vpop.permute.xlu1 %1153 }
 0x5bd   : > { %v1795_v20 = vsel %vm547_vm1, %v3998_v33, %v1154_v15 }
 0x5c0   : > { %v1169_v17 = vpop.permute.xlu1 %1168 }
 0x5c1   : > { %v1798_v57 = vsel %vm547_vm1, %v855_v18, %v1169_v17  ;;  %v719_v17 = vld [vmem:[#allocation5 + $0x18] sm:$0xff] }
 0x5c4   : > { %v1164_v48 = vpop.permute.xlu1 %1163 }
 0x5c5   : > { %v1797_v45 = vsel %vm547_vm1, %v4003_v49, %v1164_v48  ;;  %v717_v49 = vld [vmem:[#allocation5 + $0x8] sm:$0xff]  ;;  %v736_v48 = vadd.f32 %v3954_v8, %v720_v39 }
 0x5c6   : > { %v721_v51 = vmul.f32 %v3898_v40, %v717_v49  ;;  %v1027_v47 = vmul.f32 %v3914_v44, %v717_v49  ;;  %v1341_v37 = vmul.f32 %v3920_v54, %v717_v49  ;;  %v1653_v12 = vmul.f32 %v3924_v32, %v717_v49 }
 0x5c7   : > { %v1340_v32 = vmul.f32 %v3957_v0, %v716_v41 }
 0x5c8   : > { %v1466_v55 = vpop.permute.xlu1 %1465  ;;  %v737_v62 = vadd.f32 %v3967_v2, %v721_v51  ;;  %v1026_v2 = vmul.f32 %v3940_v4, %v716_v41 }
 0x5c9   : > { %v1800_v11 = vsel %vm1799_vm7, %v1795_v20, %v1466_v55  ;;  %v1029_v20 = vmul.f32 %v3945_v14, %v719_v17  ;;  %v1652_v55 = vmul.f32 %v3974_v52, %v716_v41  ;;  %v1655_v52 = vmul.f32 %v3978_v22, %v719_v17 }
 0x5cc   : > { %v1481_v21 = vpop.permute.xlu1 %1480 }
 0x5cd   : > { %v1803_v6 = vsel %vm1799_vm7, %v1798_v57, %v1481_v21 }
 0x5d0   : > { %v1476_v24 = vpop.permute.xlu1 %1475 }
 0x5d1   : > { %v1802_v59 = vsel %vm1799_vm7, %v1797_v45, %v1476_v24  ;;  %v718_v24 = vld [vmem:[#allocation5 + $0x10] sm:$0xff] }
 0x5d2   : > { %v1028_v8 = vmul.f32 %v3950_v3, %v718_v24  ;;  %v1654_v22 = vmul.f32 %v3981_v31, %v718_v24 }
 0x5d5   : > { %v1778_v46 = vpop.permute.xlu1 %1777 }
 0x5d6   : > { %v4044_v18 = vsel %vm1804_vm8, %v1800_v11, %v1778_v46  ;;  %v1343_v11 = vmul.f32 %v3965_v13, %v719_v17  ;;  %v1342_v13 = vmul.f32 %v3970_v16, %v718_v24 }
 0x5d9   : > { %v1793_v38 = vpop.permute.xlu1 %1792 }
 0x5da   : > { %v4047_v33 = vsel %vm1804_vm8, %v1803_v6, %v1793_v38  ;;  %v723_v6 = vmul.f32 %v3909_v34, %v719_v17  ;;  %v722_v38 = vmul.f32 %v3903_v30, %v718_v24  ;;  %v1869_v24 = vld [vmem:[#allocation3] sm:$0xff] }
 0x5dc   : > { %v739_v46 = vadd.f32 %v735_v50, %v723_v6  ;;  %v738_v3 = vadd.f32 %v3963_v56, %v722_v38 }
 0x5dd   : > { %v1788_v63 = vpop.permute.xlu1 %1787 }
 0x5de   : > { %v4050_v10 = vsel %vm1804_vm8, %v1802_v59, %v1788_v63 }
 0x5f1   : > { %v1032_v53 = vpop.xlane.xlu0 %1031 }
 0x5f2   : > { %v1042_v15 = vadd.f32 %v1032_v53, %v1026_v2  ;;  %v1870_v2 = vld [vmem:[#allocation3 + $0x18] sm:$0xff] }
 0x5f4   : > { %v1905_v4 = vsel %vm1885_vm3, %v736_v48, %v1042_v15 }
 0x5fe   : > { %v1349_v42 = vpop.xlane.xlu0 %1348 }
 0x5ff   : > { %v1357_v58 = vadd.f32 %v1349_v42, %v1341_v37 }
 0x60f   : > { %v1661_v60 = vpop.xlane.xlu0 %1660  ;;  %v1035_v9 = vpop.xlane.xlu1 %1034 }
 0x610   : > { %v1043_v23 = vadd.f32 %v1035_v9, %v1027_v47  ;;  %v1669_v36 = vadd.f32 %v1661_v60, %v1653_v12 }
 0x612   : > { %v1906_v5 = vsel %vm1885_vm3, %v737_v62, %v1043_v23 }
 0x613   : > { %v1910_v29 = vsel %vm1890_vm4, %v1906_v5, %v1357_v58  ;;  %v1041_v35 = vpop.xlane.xlu1 %1040 }
 0x614   : > { %v1914_v40 = vsel %vm1895_vm5, %v1910_v29, %v1669_v36  ;;  %v1045_v0 = vadd.f32 %v1041_v35, %v1029_v20 }
 0x615   : > { %1918 = vst.msk [vmem:[#allocation5 + $0x8] sm:$0xff] %vm1900_vm6, %v1914_v40 }
 0x616   : > { %v1908_v63 = vsel %vm1885_vm3, %v739_v46, %v1045_v0 }
 0x617   : > { %v1038_v44 = vpop.xlane.xlu1 %1037 }
 0x618   : > { %v1044_v53 = vadd.f32 %v1038_v44, %v1028_v8  ;;  %v1871_v8 = vld [vmem:[#allocation3 + $0x8] sm:$0xff] }
 0x61a   : > { %v1907_v47 = vsel %vm1885_vm3, %v738_v3, %v1044_v53 }
 0x61b   : > { %v1346_v54 = vpop.xlane.xlu1 %1345 }
 0x61c   : > { %v1356_v57 = vadd.f32 %v1346_v54, %v1340_v32  ;;  %v1806_v32 = vsel %vm1804_vm8, %v4019_v1, %v4052_v61 }
 0x61d   : > { %v1874_v17 = vmul.f32 %v1870_v2, %v1806_v32 }
 0x61e   : > { %v1909_v19 = vsel %vm1890_vm4, %v1905_v4, %v1356_v57 }
 0x61f   : > { %v1355_v7 = vpop.xlane.xlu1 %1354 }
 0x620   : > { %v1359_v59 = vadd.f32 %v1355_v7, %v1343_v11  ;;  %v1872_v11 = vld [vmem:[#allocation3 + $0x10] sm:$0xff] }
 0x621   : > { %v1876_v1 = vmul.f32 %v1872_v11, %v4047_v33 }
 0x622   : > { %v1912_v42 = vsel %vm1890_vm4, %v1908_v63, %v1359_v59  ;;  %v1873_v59 = vmul.f32 %v1869_v24, %v4044_v18 }
 0x623   : > { %v1352_v43 = vpop.xlane.xlu1 %1351 }
 0x624   : > { %v1358_v50 = vadd.f32 %v1352_v43, %v1342_v13  ;;  %v1875_v13 = vmul.f32 %v1871_v8, %v4050_v10 }
 0x626   : > { %v1911_v30 = vsel %vm1890_vm4, %v1907_v47, %v1358_v50 }
 0x627   : > { %v1658_v21 = vpop.xlane.xlu1 %1657 }
 0x628   : > { %v1668_v45 = vadd.f32 %v1658_v21, %v1652_v55 }
 0x62a   : > { %v1913_v14 = vsel %vm1895_vm5, %v1909_v19, %v1668_v45 }
 0x62b   : > { %1917 = vst.msk [vmem:[#allocation5] sm:$0xff] %vm1900_vm6, %v1913_v14  ;;  %v1667_v34 = vpop.xlane.xlu1 %1666 }
 0x62c   : > { %v1671_v49 = vadd.f32 %v1667_v34, %v1655_v52 }
 0x62e   : > { %v1916_v51 = vsel %vm1895_vm5, %v1912_v42, %v1671_v49 }
 0x62f   : > { %1920 = vst.msk [vmem:[#allocation5 + $0x18] sm:$0xff] %vm1900_vm6, %v1916_v51  ;;  %v1664_v16 = vpop.xlane.xlu1 %1663 }
 0x630   : > { %v1670_v37 = vadd.f32 %v1664_v16, %v1654_v22 }
 0x632   : > { %v1915_v60 = vsel %vm1895_vm5, %v1911_v30, %v1670_v37 }
 0x633   : > { %1919 = vst.msk [vmem:[#allocation5 + $0x10] sm:$0xff] %vm1900_vm6, %v1915_v60 }
 0x641   : > { %v2549_v9 = vpop.f32.mrf.mxu0 }
 0x642   : > { %1815 = vrot.lane.b32.xlu1 %v2549_v9, %s3250_s11 }
 0x643   : > { %v1132_v56 = vpop.f32.mrf.mxu0 }
 0x645   : > { %v2552_v62 = vpop.f32.mrf.mxu0 }
 0x646   : > { %1813 = vrot.lane.b32.xlu1 %v1132_v56, %s3250_s11 }
 0x647   : > { %v1142_v31 = vpop.f32.mrf.mxu0 }
 0x649   : > { %v2569_v12 = vpop.f32.mrf.mxu0 }
 0x64a   : > { %1819 = vrot.lane.b32.xlu1 %v2552_v62, %s3250_s11 }
 0x64b   : > { %v1444_v23 = vpop.f32.mrf.mxu0 }
 0x64d   : > { %v2572_v58 = vpop.f32.mrf.mxu0 }
 0x64e   : > { %1817 = vrot.lane.b32.xlu1 %v1142_v31, %s3250_s11 }
 0x64f   : > { %v1454_v36 = vpop.f32.mrf.mxu0 }
 0x651   : > { %v2589_v5 = vpop.f32.mrf.mxu0 }
 0x652   : > { %1831 = vrot.lane.b32.xlu1 %v2569_v12, %s3249_s12  ;;  %1847 = vrot.lane.b32.xlu0 %v2589_v5, %s3248_s22 }
 0x653   : > { %v1756_v29 = vpop.f32.mrf.mxu0 }
 0x655   : > { %v2592_v35 = vpop.f32.mrf.mxu0 }
 0x656   : > { %1829 = vrot.lane.b32.xlu1 %v1444_v23, %s3249_s12  ;;  %1851 = vrot.lane.b32.xlu0 %v2592_v35, %s3248_s22 }
 0x657   : > { %v1766_v40 = vpop.f32.mrf.mxu0 }
 0x65a   : > { %1835 = vrot.lane.b32.xlu1 %v2572_v58, %s3249_s12 }
 0x65e   : > { %1833 = vrot.lane.b32.xlu1 %v1454_v36, %s3249_s12 }
 0x662   : > { %1845 = vrot.lane.b32.xlu1 %v1756_v29, %s3248_s22 }
 0x666   : > { %1849 = vrot.lane.b32.xlu1 %v1766_v40, %s3248_s22 }
 0x6b4   : > { %v1816_v44 = vpop.permute.xlu1 %1815 }
 0x6b5   : > { %v1858_v43 = vsel %vm547_vm1, %v3734_v25, %v1816_v44 }
 0x6b8   : > { %v1814_v54 = vpop.permute.xlu1 %1813 }
 0x6b9   : > { %v1857_v19 = vsel %vm547_vm1, %v3736_v26, %v1814_v54 }
 0x6bc   : > { %v1820_v7 = vpop.permute.xlu1 %1819 }
 0x6bd   : > { %v1860_v21 = vsel %vm547_vm1, %v3738_v27, %v1820_v7 }
 0x6c0   : > { %v1818_v41 = vpop.permute.xlu1 %1817 }
 0x6c1   : > { %v1859_v52 = vsel %vm547_vm1, %v3740_v28, %v1818_v41 }
 0x6c4   : > { %v1848_v39 = vpop.permute.xlu0 %1847  ;;  %v1832_v15 = vpop.permute.xlu1 %1831 }
 0x6c5   : > { %v1862_v57 = vsel %vm1799_vm7, %v1858_v43, %v1832_v15 }
 0x6c6   : > { %v1866_v48 = vsel %vm1804_vm8, %v1862_v57, %v1848_v39 }
 0x6c7   : > { %v1878_v20 = vadd.f32 %v1874_v17, %v1866_v48 }
 0x6c8   : > { %v1830_v55 = vpop.permute.xlu1 %1829  ;;  %v1852_v61 = vpop.permute.xlu0 %1851 }
 0x6c9   : > { %1882 = vst [vmem:[#allocation3 + $0x18] sm:$0xff] %v1878_v20  ;;  %v1861_v46 = vsel %vm1799_vm7, %v1857_v19, %v1830_v55 }
 0x6cc   : > { %v1836_v6 = vpop.permute.xlu1 %1835 }
 0x6cd   : > { %v1864_v25 = vsel %vm1799_vm7, %v1860_v21, %v1836_v6 }
 0x6ce   : > { %v1868_v4 = vsel %vm1804_vm8, %v1864_v25, %v1852_v61 }
 0x6cf   : > { %v1880_v0 = vadd.f32 %v1876_v1, %v1868_v4 }
 0x6d0   : > { %v1834_v45 = vpop.permute.xlu1 %1833 }
 0x6d1   : > { %1884 = vst [vmem:[#allocation3 + $0x10] sm:$0xff] %v1880_v0  ;;  %v1863_v34 = vsel %vm1799_vm7, %v1859_v52, %v1834_v45 }
 0x6d4   : > { %v1846_v27 = vpop.permute.xlu1 %1845 }
 0x6d5   : > { %v1865_v33 = vsel %vm1804_vm8, %v1861_v46, %v1846_v27 }
 0x6d6   : > { %v1877_v14 = vadd.f32 %v1873_v59, %v1865_v33 }
 0x6d8   : > { %1881 = vst [vmem:[#allocation3] sm:$0xff] %v1877_v14  ;;  %v1850_v38 = vpop.permute.xlu1 %1849  ;;  %1924 = sbr.rel (%p2379_p3) target bundleno = 2133 (0x855), region = 72 }
 0x6d9   : > { %v1867_v26 = vsel %vm1804_vm8, %v1863_v34, %v1850_v38 }
 0x6da   : > { %v1879_v63 = vadd.f32 %v1875_v13, %v1867_v26 }
 0x6dc   : > { %1883 = vst [vmem:[#allocation3 + $0x8] sm:$0xff] %v1879_v63 }
 0x6dd   : > { %v1925_v18 = vld [vmem:[#allocation5] sm:$0xff]  ;;  %v1927_v53 = vld [vmem:[#allocation5 + $0x10] sm:$0xff]  ;;  %v3254_v49 = vmov 1   ;;  %v3255_v42 = vmov 0   ;;  %v1926_v28 = vld [vmem:[#allocation5 + $0x8] sm:$0xff]  ;;  %v3256_v62 = vmov 2  }
 0x6de   : > { %2940 = vset.pattern.permute.xlu1 %v3254_v49  ;;  %2939 = vset.pattern.permute.xlu0 %v3255_v42  ;;  %2948 = vrcp.f32 %v1925_v18  ;;  %v1928_v10 = vld [vmem:[#allocation5 + $0x18] sm:$0xff]  ;;  %v2035_v51 = vld [vmem:[#allocation14 + $0x70] sm:$0xff]  ;;  %v2034_v16 = vld [vmem:[#allocation14 + $0x68] sm:$0xff]  ;;  %v3257_v23 = vmov 3  }
 0x6df   : > { %2950 = vrcp.f32 %v1927_v53  ;;  %v2036_v3 = vld [vmem:[#allocation14 + $0x78] sm:$0xff]  ;;  %v2033_v30 = vld [vmem:[#allocation14 + $0x60] sm:$0xff]  ;;  %v2031_v9 = vld [vmem:[#allocation14 + $0x50] sm:$0xff] }
 0x6e0   : > { %2952 = vrcp.f32 %v1926_v28  ;;  %2663 = vmatprep.subr.mxu1 %v2036_v3  ;;  %2593 = vmatprep.subr.mxu0 %v2036_v3  ;;  %v2032_v60 = vld [vmem:[#allocation14 + $0x58] sm:$0xff]  ;;  %v2030_v56 = vld [vmem:[#allocation14 + $0x48] sm:$0xff]  ;;  %v2029_v31 = vld [vmem:[#allocation14 + $0x40] sm:$0xff] }
 0x6e1   : > { %2954 = vrcp.f32 %v1928_v10  ;;  %2679 = vmatpush3.msra.mxu1 %v2036_v3  ;;  %2594 = vmatpush3.msra.mxu0 %v2036_v3  ;;  %v2028_v12 = vld [vmem:[#allocation14 + $0x38] sm:$0xff]  ;;  %v2027_v58 = vld [vmem:[#allocation14 + $0x30] sm:$0xff]  ;;  %v2026_v36 = vld [vmem:[#allocation14 + $0x28] sm:$0xff] }
 0x6e2   : > { %2664 = vmatprep.subr.mxu1 %v2035_v51  ;;  %2595 = vmatprep.subr.mxu0 %v2035_v51  ;;  %v2025_v5 = vld [vmem:[#allocation14 + $0x20] sm:$0xff]  ;;  %v2024_v29 = vld [vmem:[#allocation14 + $0x18] sm:$0xff]  ;;  %v2023_v35 = vld [vmem:[#allocation14 + $0x10] sm:$0xff] }
 0x6e3   : > { %2680 = vmatpush3.msra.mxu1 %v2035_v51  ;;  %2596 = vmatpush3.msra.mxu0 %v2035_v51  ;;  %v2022_v40 = vld [vmem:[#allocation14 + $0x8] sm:$0xff]  ;;  %v2021_v44 = vld [vmem:[#allocation14] sm:$0xff]  ;;  %v2016_v59 = vld [vmem:[#allocation3 + $0x10] sm:$0xff] }
 0x6e4   : > { %2665 = vmatprep.subr.mxu1 %v2034_v16  ;;  %2597 = vmatprep.subr.mxu0 %v2034_v16  ;;  %v2013_v20 = vld [vmem:[#allocation3] sm:$0xff]  ;;  %v2015_v24 = vld [vmem:[#allocation3 + $0x8] sm:$0xff]  ;;  %v2014_v13 = vld [vmem:[#allocation3 + $0x18] sm:$0xff] }
 0x6e5   : > { %2681 = vmatpush3.msra.mxu1 %v2034_v16  ;;  %2598 = vmatpush3.msra.mxu0 %v2034_v16  ;;  %v2380_v18 = vld [vmem:[%s4330_s16] ss:$0 sm:$0xff] }
 0x6e6   : > { %2666 = vmatprep.subr.mxu1 %v2033_v30  ;;  %2599 = vmatprep.subr.mxu0 %v2033_v30 }
 0x6e7   : > { %2682 = vmatpush3.msra.mxu1 %v2033_v30  ;;  %2600 = vmatpush3.msra.mxu0 %v2033_v30 }
 0x6e8   : > { %2667 = vmatprep.subr.mxu1 %v2032_v60  ;;  %2601 = vmatprep.subr.mxu0 %v2032_v60 }
 0x6e9   : > { %2683 = vmatpush3.msra.mxu1 %v2032_v60  ;;  %2602 = vmatpush3.msra.mxu0 %v2032_v60 }
 0x6ea   : > { %2668 = vmatprep.subr.mxu1 %v2031_v9  ;;  %2603 = vmatprep.subr.mxu0 %v2031_v9 }
 0x6eb   : > { %v2949_v50 = vpop.eup %2948  ;;  %2684 = vmatpush3.msra.mxu1 %v2031_v9  ;;  %2604 = vmatpush3.msra.mxu0 %v2031_v9 }
 0x6ec   : > { %1954 = vperm.xlu1 %2940, %v2949_v50   ;;  %1935 = vperm.xlu0 %2939, %v2949_v50   ;;  %v4124_v22 = vpop.eup %2950 }
 0x6ed   : > { %v4128_v47 = vpop.eup %2952  ;;  %2669 = vmatprep.subr.mxu1 %v2030_v56  ;;  %2605 = vmatprep.subr.mxu0 %v2030_v56 }
 0x6ee   : > { %v2955_v37 = vpop.eup %2954  ;;  %2685 = vmatpush3.msra.mxu1 %v2030_v56  ;;  %2606 = vmatpush3.msra.mxu0 %v2030_v56 }
 0x6ef   : > { %2670 = vmatprep.subr.mxu1 %v2029_v31  ;;  %2607 = vmatprep.subr.mxu0 %v2029_v31 }
 0x6f0   : > { %1962 = vperm.xlu1 %2940, %v4124_v22   ;;  %1945 = vperm.xlu0 %2939, %v4124_v22  }
 0x6f1   : > { %2686 = vmatpush3.msra.mxu1 %v2029_v31  ;;  %2608 = vmatpush3.msra.mxu0 %v2029_v31 }
 0x6f2   : > { %2671 = vmatprep.subr.mxu1 %v2028_v12  ;;  %2609 = vmatprep.subr.mxu0 %v2028_v12 }
 0x6f3   : > { %2687 = vmatpush3.msra.mxu1 %v2028_v12  ;;  %2610 = vmatpush3.msra.mxu0 %v2028_v12 }
 0x6f4   : > { %2941 = vset.pattern.permute.xlu1 %v3255_v42  ;;  %1940 = vperm.xlu0 %2939, %v4128_v47  }
 0x6f5   : > { %1950 = vperm.xlu1 %2941, %v2955_v37   ;;  %2672 = vmatprep.subr.mxu1 %v2027_v58 }
 0x6f6   : > { %2688 = vmatpush3.msra.mxu1 %v2027_v58  ;;  %2611 = vmatprep.subr.mxu0 %v2027_v58 }
 0x6f7   : > { %2673 = vmatprep.subr.mxu1 %v2026_v36  ;;  %2612 = vmatpush3.msra.mxu0 %v2027_v58 }
 0x6f8   : > { %2942 = vset.pattern.permute.xlu0 %v3254_v49  ;;  %2689 = vmatpush3.msra.mxu1 %v2026_v36 }
 0x6f9   : > { %2943 = vset.pattern.permute.xlu1 %v3254_v49  ;;  %1958 = vperm.xlu0 %2942, %v4128_v47  }
 0x6fa   : > { %1966 = vperm.xlu1 %2943, %v2955_v37   ;;  %2674 = vmatprep.subr.mxu1 %v2025_v5 }
 0x6fb   : > { %2613 = vmatprep.subr.mxu0 %v2026_v36  ;;  %2690 = vmatpush3.msra.mxu1 %v2025_v5 }
 0x6fc   : > { %2614 = vmatpush3.msra.mxu0 %v2026_v36  ;;  %2675 = vmatprep.subr.mxu1 %v2024_v29 }
 0x6fd   : > { %2945 = vset.pattern.permute.xlu0 %v3256_v62  ;;  %2615 = vmatprep.subr.mxu0 %v2025_v5 }
 0x6fe   : > { %2944 = vset.pattern.permute.xlu1 %v3256_v62  ;;  %1978 = vperm.xlu0 %2945, %v4124_v22  }
 0x6ff   : > { %1970 = vperm.xlu1 %2944, %v2949_v50   ;;  %2691 = vmatpush3.msra.mxu1 %v2024_v29 }
 0x700   : > { %2616 = vmatpush3.msra.mxu0 %v2025_v5  ;;  %2676 = vmatprep.subr.mxu1 %v2023_v35 }
 0x701   : > { %2617 = vmatprep.subr.mxu0 %v2024_v29  ;;  %2692 = vmatpush3.msra.mxu1 %v2023_v35 }
 0x702   : > { %2946 = vset.pattern.permute.xlu0 %v3257_v23  ;;  %2618 = vmatpush3.msra.mxu0 %v2024_v29 }
 0x703   : > { %1974 = vperm.xlu1 %2944, %v4128_v47   ;;  %1986 = vperm.xlu0 %2946, %v2949_v50  }
 0x704   : > { %2677 = vmatprep.subr.mxu1 %v2022_v40  ;;  %2619 = vmatprep.subr.mxu0 %v2023_v35 }
 0x705   : > { %2693 = vmatpush3.msra.mxu1 %v2022_v40  ;;  %2620 = vmatpush3.msra.mxu0 %v2023_v35 }
 0x706   : > { %2678 = vmatprep.subr.mxu1 %v2021_v44  ;;  %2621 = vmatprep.subr.mxu0 %v2022_v40 }
 0x707   : > { %1982 = vperm.xlu1 %2944, %v2955_v37   ;;  %1998 = vperm.xlu0 %2946, %v2955_v37  }
 0x708   : > { %2694 = vmatpush3.msra.mxu1 %v2021_v44  ;;  %2622 = vmatpush3.msra.mxu0 %v2022_v40 }
 0x709   : > { %2623 = vmatprep.subr.mxu0 %v2021_v44 }
 0x70a   : > { %2624 = vmatpush3.msra.mxu0 %v2021_v44 }
 0x70b   : > { %2947 = vset.pattern.permute.xlu1 %v3257_v23 }
 0x70c   : > { %1994 = vperm.xlu1 %2947, %v4124_v22  }
 0x710   : > { %1990 = vperm.xlu1 %2947, %v4128_v47  }
 0x767   : > { %v1955_v54 = vpop.permute.xlu1 %1954  ;;  %v1936_v7 = vpop.permute.xlu0 %1935 }
 0x768   : > { %v2001_v48 = vsel %vm547_vm1, %v1936_v7, %v1955_v54 }
 0x76b   : > { %v1963_v41 = vpop.permute.xlu1 %1962  ;;  %v1946_v2 = vpop.permute.xlu0 %1945 }
 0x76c   : > { %v2003_v45 = vsel %vm547_vm1, %v1946_v2, %v1963_v41 }
 0x76f   : > { %v1941_v32 = vpop.permute.xlu0 %1940 }
 0x770   : > { %v1951_v43 = vpop.permute.xlu1 %1950 }
 0x774   : > { %v1959_v39 = vpop.permute.xlu0 %1958 }
 0x775   : > { %v1967_v15 = vpop.permute.xlu1 %1966  ;;  %v2002_v14 = vsel %vm547_vm1, %v1941_v32, %v1959_v39 }
 0x776   : > { %v2004_v25 = vsel %vm547_vm1, %v1951_v43, %v1967_v15 }
 0x779   : > { %v1979_v17 = vpop.permute.xlu0 %1978 }
 0x77a   : > { %v1971_v57 = vpop.permute.xlu1 %1970  ;;  %v2007_v19 = vsel %vm1799_vm7, %v2003_v45, %v1979_v17 }
 0x77b   : > { %v2005_v55 = vsel %vm1799_vm7, %v2001_v48, %v1971_v57 }
 0x77e   : > { %v1975_v11 = vpop.permute.xlu1 %1974  ;;  %v1987_v21 = vpop.permute.xlu0 %1986 }
 0x77f   : > { %v2009_v6 = vsel %vm1804_vm8, %v2005_v55, %v1987_v21  ;;  %v2006_v34 = vsel %vm1799_vm7, %v2002_v14, %v1975_v11 }
 0x780   : > { %v2017_v1 = vmul.f32 %v2013_v20, %v2009_v6 }
 0x782   : > { %v1983_v61 = vpop.permute.xlu1 %1982  ;;  %2625 = vmatprep.mubr.f32.mxu0 %v2017_v1  ;;  %v1999_v0 = vpop.permute.xlu0 %1998 }
 0x783   : > { %v2008_v4 = vsel %vm1799_vm7, %v2004_v25, %v1983_v61 }
 0x784   : > { %v2012_v46 = vsel %vm1804_vm8, %v2008_v4, %v1999_v0 }
 0x785   : > { %v2020_v52 = vmul.f32 %v2016_v59, %v2012_v46 }
 0x787   : > { %v1995_v27 = vpop.permute.xlu1 %1994 }
 0x788   : > { %v2011_v8 = vsel %vm1804_vm8, %v2007_v19, %v1995_v27 }
 0x789   : > { %v2019_v33 = vmul.f32 %v2015_v24, %v2011_v8 }
 0x78b   : > { %v1991_v38 = vpop.permute.xlu1 %1990  ;;  %2628 = vmatprep.mubr.f32.mxu1 %v2019_v33 }
 0x78c   : > { %v2010_v26 = vsel %vm1804_vm8, %v2006_v34, %v1991_v38  ;;  %2629 = vmatmul.mubr.f32.vlgmr.msra.gmra.mxu1 %v2020_v52 }
 0x78d   : > { %v2018_v63 = vmul.f32 %v2014_v13, %v2010_v26 }
 0x78f   : > { %2626 = vmatmul.mubr.f32.vlgmr.msra.gmra.mxu0 %v2018_v63 }
 0x84c   : > { %v2630_v53 = vpop.f32.mrf.mxu1 }
 0x84d   : > { %v2126_v49 = vadd.f32 %v2630_v53, %v2380_v18 }
 0x84e   : > { %v2120_v42 = vpop.f32.mrf.mxu1 }
 0x84f   : > { %2132 = vst [vmem:[%s3590_s27 + $0x18] sm:$0xff] %v2126_v49  ;;  %v2121_v28 = vadd.f32 %v2380_v18, %v2120_v42  ;;  %v2627_v10 = vpop.f32.mrf.mxu0 }
 0x850   : > { %v2116_v50 = vadd.f32 %v2627_v10, %v2380_v18 }
 0x851   : > { %2131 = vst [vmem:[%s3590_s27 + $0x10] sm:$0xff] %v2121_v28  ;;  %v2110_v3 = vpop.f32.mrf.mxu0 }
 0x852   : > { %2130 = vst [vmem:[%s3590_s27 + $0x8] sm:$0xff] %v2116_v50  ;;  %v2111_v51 = vadd.f32 %v2380_v18, %v2110_v3 }
 0x854   : > { %2129 = vst [vmem:[%s3590_s27] sm:$0xff] %v2111_v51 }
 0x855 PF: > { %s4331_s10 = sld [smem:[#allocation24_spill]]  ;;  %s2149_s20 = sshll.u32 %s3590_s27, 4  ;;  %s4158_s20 = int_to_ptr.vmem [resolvable:$true] %s2149_s20 }
 0x856   : > { %s4332_s4 = sld [smem:[#allocation25_spill]]  ;;  %s2134_s22 = scalar_lea.sflag [#allocation8], %s3566_s5 }
 0x857   : > { %s4333_s2 = sld [smem:[#allocation33_spill]]  ;;  %s3092_s12 = scalar_lea.vmem %s4158_s20, 512 }
 0x858   : > { %s4334_s6 = sld [smem:[#allocation40_spill]]  ;;  %p3093_p8 = scmp.ne.s32.totalorder %s4158_s20, %s3092_s12 }
 0x859   : > { %s3258_s11 = smov [#allocation15]  }
 0x85a   : > { %s3096_s27 = sshll.u32 %s3258_s11, 4  ;;  %s3097_s27 = int_to_ptr.vmem [resolvable:$false] %s3096_s27 }
 0x85b   : > { %s2382_s1 = sshll.u32 %s4331_s10, 2  ;;  %s3098_s21 = scalar_lea.vmem %s3097_s27, 1024 }
 0x85c   : > { %s2383_s28 = sshll.u32 %s4332_s4, 3  ;;  %p3099_p6 = scmp.lt.s32.totalorder %s4158_s20, %s3097_s27 }
 0x85d   : > { %s2146_s13 = sadd.s32 %s2383_s28, %s2382_s1  ;;  %p4335_p9 = scmp.ne.s32.totalorder %s4333_s2, 0 }
 0x85e   : > { %s2384_s25 = sshll.u32 %s2146_s13, 7  ;;  %p3100_p7 = scmp.lt.s32.totalorder %s3098_s21, %s3092_s12 }
 0x85f   : > { %s4163_s29 = scalar_lea.hbm %s4334_s6, %s2384_s25  ;;  %p3094_p1 = pnand %p3093_p8, %p4335_p9 }
 0x860   : > { %p3101_p2 = por %p3100_p7, %p3099_p6 }
 0x861   : > { %p3095_p13 = pneg %p3094_p1 }
 0x863   : > { %p3102_p11 = pnand %p3101_p2, %p3095_p13 }
 0x865   : > { %3105 = shalt.err (!%p3102_p11)
}
 0x866   : > { %s3106_s24 = scalar_lea.hbm %s4163_s29, 512  ;;  %s3110_s10 = scalar_lea.hbm %s4334_s6, 2048 }
 0x867   : > { %p3107_p12 = scmp.ne.s32.totalorder %s4163_s29, %s3106_s24  ;;  %p3111_p4 = scmp.lt.s32.totalorder %s4163_s29, %s4334_s6 }
 0x868   : > { %p3112_p0 = scmp.lt.s32.totalorder %s3110_s10, %s3106_s24 }
 0x869   : > { %p3108_p10 = pnand %p3107_p12, %p4335_p9 }
 0x86a   : > { %p3113_p3 = por %p3112_p0, %p3111_p4 }
 0x86b   : > { %p3109_p5 = pneg %p3108_p10 }
 0x86d   : > { %p3114_p8 = pnand %p3113_p3, %p3109_p5 }
 0x86f   : > { %3117 = shalt.err (!%p3114_p8)
}
 0x870   : > { %s3259_s28 = smov 128   ;;  %s3260_s13 = smov 8  }
 0x871   : > { %2709 = dma.vmem_to_hbm [thread:$0]  (%p4335_p9), %s4158_s20, 512, %s4163_s29, %s2134_s22, %s3259_s28, %s3259_s28, %s3260_s13  }
 0x872 PF: > { %s4336_s25 = sld [smem:[#allocation21_spill]]  ;;  %p2737_p1 = scmp.ge.s32.totalorder %s3236_s9, 2 }
 0x873   : > { %s4337_s18 = sld [smem:[#allocation30_spill]] }
 0x878   : > { %s2164_s17 = sand.u32 1, %s4336_s25  }
 0x879   : > { %p4338_p13 = scmp.ne.s32.totalorder %s4337_s18, 0  ;;  %s2165_s12 = scalar_lea.sflag [#allocation8], %s2164_s17 }
 0x87b   : > { %p2729_p6 = pnand %p2737_p1, %p4338_p13 }
 0x87d   : > { %p2730_p7 = pneg %p2729_p6 }
 0x87f   : > { %3183 = dma.done.wait (%p2730_p7), %s2165_s12, 512  }
 0x880   : > { %3185 = vsyncadd (%p2730_p7), %s2165_s12, 4294966784  ;;  %s26_s9 = sadd.s32 1, %s3236_s9   ;;  %s4340_s21 = sld [smem:[#allocation20_spill]] }
 0x881   : > { %p4193_p2 = scmp.ge.s32.totalorder %s26_s9, 10   ;;  %s4341_s24 = sld [smem:[#allocation22_spill]] }
 0x882   : > { %s4342_s28 = sld [smem:[#allocation26_spill]]  ;;  %s4344_s22 = smov %s3196_s23 }
 0x883   : > { %s4343_s5 = sld [smem:[#allocation34_spill]]  ;;  %s4345_s23 = smov %s3520_s15 }
 0x884   : > { %s4346_s25 = smov %s3208_s26  ;;  %s4347_s26 = smov %s3515_s7 }
 0x885   : > { %s4348_s27 = smov %s3224_s30  ;;  %s4349_s29 = smov %s3232_s8 }
 0x886   : > { %s4350_s30 = smov %s4354_s19  ;;  %s4352_s8 = smov %s4362_s14 }
 0x887   :  { %25 = sbr.rel (!%p4193_p2) target bundleno = 20 (0x14), region = 129 }
 0x889   : > { %s4351_s7 = smov %s4343_s5 }
 0x88c   :  { %2170 = vsyncpa [#allocation7], 1 }
 0x88d   :  { %2172 = vsyncpa [#allocation7 + $0x1], 1 }
 0x88e   :  { %2173 = vsyncpa [#allocation10], 1 }
 0x88f   :  { %2175 = vsyncpa [#allocation10 + $0x1], 1 }
 0x890   :  { %2176 = vsyncpa [#allocation13], 1 }
 0x891   :  { %2177 = vsyncpa [#allocation8], 1 }
 0x892   :  { %2179 = vsyncpa [#allocation8 + $0x1], 1 }

</bundles_post_ra>
